<compile_context>
chip_gen: v7x
topology: tpu7x:2x2x1
jax: 0.10.0
libtpu: 0.0.40
codegen_flags: <defaults>
</compile_context>

<pallas_src>
import jax
import jax.numpy as jnp
from jax.experimental import pallas as pl
from jax.experimental.pallas import tpu as pltpu


SCALE_FACTOR = float(200.0 ** 0.5)     # np.sqrt(200)
IN_SHAPE_1 = 128.0                     # self.in_shape[1]
FEAT = 256                             # Regressor out_shape=[256]
HID = 128                              # FullyConnectedNet hidden=[128]
OUT_RAW = 63                           # FullyConnectedNet out_channels
OUT_PAD = 128                          # lane-padded head width


# ----------------------------------------------------------------------------
# Fused kernel: backbone-linear (K-accumulated on MXU) -> Linear -> PReLU
#               -> Linear -> tanh, all VMEM-resident.
# ----------------------------------------------------------------------------
def _fused_head_kernel(x_ref, w0_ref, b0_ref, w1_ref, b1_ref, a1_ref,
                       w2_ref, b2_ref, o_ref, acc_ref):
    k = pl.program_id(0)

    @pl.when(k == 0)
    def _():
        acc_ref[...] = jnp.zeros_like(acc_ref)

    # Backbone stand-in partial matmul: bf16 operands, f32 MXU accumulation.
    acc_ref[...] += jnp.dot(x_ref[...].astype(w0_ref.dtype), w0_ref[...],
                            preferred_element_type=jnp.float32)

    @pl.when(k == pl.num_programs(0) - 1)
    def _():
        h0 = acc_ref[...] + b0_ref[...]                        # (Bp, 256) f32
        # FullyConnectedNet(256, 63, [128]): Linear -> PReLU -> Linear
        h1 = jnp.dot(h0, w1_ref[...],
                     preferred_element_type=jnp.float32) + b1_ref[...]
        h1 = jnp.where(h1 >= 0.0, h1, h1 * a1_ref[...])        # PReLU (1 param)
        h2 = jnp.dot(h1, w2_ref[...],
                     preferred_element_type=jnp.float32) + b2_ref[...]
        o_ref[...] = jnp.tanh(h2).astype(o_ref.dtype)          # (Bp, 128)


def _pick_tk(K, n_cols, itemsize, budget_bytes=8 << 20):
    """Largest power-of-two divisor tile of K whose (tk, n_cols) weight slab
    stays under `budget_bytes`, so the double-buffered footprint sits well
    inside the 32 MiB scoped-VMEM default on v5e/v6e/v7x.  For the example
    shapes (K = 4096, bf16) tk == K, i.e. grid == (1,)."""
    tk = K
    while tk > 128 and tk * n_cols * itemsize > budget_bytes:
        tk //= 2
    assert K % tk == 0 and tk % 128 == 0, (K, tk)
    return tk


def fused_head(x, params):
    """x: (Bp, K) f32, Bp a multiple of 8, K a multiple of 128.
    Returns (Bp, 128) f32: tanh of the 63-wide head, zero-padded to 128."""
    Bp, K = x.shape
    w0 = params["w0"]
    tk = _pick_tk(K, w0.shape[1], w0.dtype.itemsize)
    nk = K // tk

    full = lambda shape: pl.BlockSpec(shape, lambda k: (0, 0))

    return pl.pallas_call(
        _fused_head_kernel,
        out_shape=jax.ShapeDtypeStruct((Bp, OUT_PAD), jnp.float32),
        grid_spec=pltpu.PrefetchScalarGridSpec(
            num_scalar_prefetch=0,
            grid=(nk,),
            in_specs=[
                pl.BlockSpec((Bp, tk), lambda k: (0, k)),      # x (activations)
                pl.BlockSpec((tk, FEAT), lambda k: (k, 0)),    # w0 (bf16)
                full((1, FEAT)),                               # b0
                full((FEAT, HID)),                             # w1
                full((1, HID)),                                # b1
                full((1, 1)),                                  # PReLU slope
                full((HID, OUT_PAD)),                          # w2 (63 -> 128)
                full((1, OUT_PAD)),                            # b2 (63 -> 128)
            ],
            out_specs=pl.BlockSpec((Bp, OUT_PAD), lambda k: (0, 0)),
            scratch_shapes=[pltpu.VMEM((Bp, FEAT), jnp.float32)],
        ),
        # K is a reduction axis -> "arbitrary".  If batch ever grows beyond
        # toy sizes, add a leading batch grid axis marked "parallel" so v7x's
        # two TensorCores split the work.
        compiler_params=pltpu.CompilerParams(
            dimension_semantics=("arbitrary",)),
    )(x, w0, params["b0"], params["w1"], params["b1"], params["a1"],
      params["w2"], params["b2"])


# ----------------------------------------------------------------------------
# Parameter construction (deterministic, synthetic), pre-padded at init.
# ----------------------------------------------------------------------------
def make_params(key, spatial, in_channels=1):
    D, H, W = spatial
    K = in_channels * D * H * W
    ks = jax.random.split(key, 6)

    def init(k, shape, fan_in):
        return jax.random.normal(k, shape, jnp.float32) / jnp.sqrt(fan_in)

    p = {}
    # UNet + Regressor backbone stand-in: flatten -> Linear(K, 256).
    # bf16 storage (workload is weight-streaming bound); accumulation is f32.
    p["w0"] = init(ks[0], (K, FEAT), K).astype(jnp.bfloat16)
    p["b0"] = init(ks[1], (1, FEAT), FEAT)
    # FullyConnectedNet(256, 63, [128], act=PReLU)
    p["w1"] = init(ks[2], (FEAT, HID), FEAT)
    p["b1"] = init(ks[3], (1, HID), HID)
    p["a1"] = jnp.full((1, 1), 0.25, jnp.float32)      # nn.PReLU() default
    w2 = init(ks[4], (HID, OUT_RAW), HID)
    b2 = init(ks[5], (1, OUT_RAW), OUT_RAW)
    # Pad the 63-wide head to 128 lanes once at init (lane-dense stores);
    # the forward wrapper slices the kernel output back to 63.
    p["w2"] = jnp.pad(w2, ((0, 0), (0, OUT_PAD - OUT_RAW)))
    p["b2"] = jnp.pad(b2, ((0, 0), (0, OUT_PAD - OUT_RAW)))
    return p


# ----------------------------------------------------------------------------
# UNetRegressor forward
# ----------------------------------------------------------------------------
def unet_regressor_forward(params, x_in):
    """x_in: (B, C, D, H, W) float32 -> (B, 11, 3, 2) float32."""
    B = x_in.shape[0]

    # --- backbone stand-in + hidden MLP + tanh: ONE fused Pallas kernel -----
    x_flat = x_in.astype(jnp.float32).reshape(B, -1)
    K = x_flat.shape[1]
    assert K % 128 == 0, K                 # keep weight pads off the hot path
    Bp = ((B + 7) // 8) * 8                # sublane-pad the batch
    if Bp != B:
        x_flat = jnp.pad(x_flat, ((0, Bp - B), (0, 0)))
    x63 = fused_head(x_flat, params)[:B, :OUT_RAW]            # (B, 63)

    # --- post-processing glue (tiny elementwise, plain JAX) -----------------
    out = x63[:, 3:].reshape(B, -1, 3, 2)                     # (B, 10, 3, 2)
    mags = out[..., 0] * SCALE_FACTOR
    angles = out[..., 1] * jnp.pi
    real = mags * jnp.cos(angles)
    imag = mags * jnp.sin(angles)
    out = jnp.stack([real, imag], axis=-1)                    # (B, 10, 3, 2)

    centroid = x63[:, :3][:, None, :] * (IN_SHAPE_1 * 0.5 * 0.5)   # (B, 1, 3)
    centroid = jnp.stack([centroid, jnp.zeros_like(centroid)], axis=-1)

    return jnp.concatenate([centroid, out], axis=1)           # (B, 11, 3, 2)


# ----------------------------------------------------------------------------
if __name__ == "__main__":
    B, C, D, H, W = 2, 1, 16, 16, 16
    x_in = jax.random.normal(jax.random.PRNGKey(0), (B, C, D, H, W),
                             jnp.float32)
    params = make_params(jax.random.PRNGKey(42), (D, H, W), in_channels=C)

    fwd = jax.jit(unet_regressor_forward)
    out = jax.block_until_ready(fwd(params, x_in))

    assert out.shape == (B, 11, 3, 2), out.shape
    assert out.dtype == jnp.float32
    assert bool(jnp.all(jnp.isfinite(out)))
    print("KERNEL_OK")
</pallas_src>

<mosaic_0001>
module attributes {stable_mosaic.version = 11 : i64} {
  func.func @_fused_head_kernel(%arg0: i32, %arg1: memref<8x4096xf32, #tpu.memory_space<vmem>>, %arg2: memref<4096x256xbf16, #tpu.memory_space<vmem>>, %arg3: memref<1x256xf32, #tpu.memory_space<vmem>>, %arg4: memref<256x128xf32, #tpu.memory_space<vmem>>, %arg5: memref<1x128xf32, #tpu.memory_space<vmem>>, %arg6: memref<1x1xf32, #tpu.memory_space<vmem>>, %arg7: memref<128x128xf32, #tpu.memory_space<vmem>>, %arg8: memref<1x128xf32, #tpu.memory_space<vmem>>, %arg9: memref<8x128xf32, #tpu.memory_space<vmem>>, %arg10: memref<8x256xf32, #tpu.memory_space<vmem>>) attributes {dimension_semantics = [#tpu.dimension_semantics<arbitrary>], iteration_bounds = array<i64: 1>, scalar_prefetch = 0 : i64, scratch_operands = 1 : i64, tpu.core_type = #tpu.core_type<tc>, window_params = [{transform_indices = @transform_0, window_bounds = array<i64: 8, 4096>}, {transform_indices = @transform_1, window_bounds = array<i64: 4096, 256>}, {pipeline_mode = #tpu.pipeline_mode<synchronous>, transform_indices = @transform_2, window_bounds = array<i64: 1, 256>}, {pipeline_mode = #tpu.pipeline_mode<synchronous>, transform_indices = @transform_3, window_bounds = array<i64: 256, 128>}, {pipeline_mode = #tpu.pipeline_mode<synchronous>, transform_indices = @transform_4, window_bounds = array<i64: 1, 128>}, {pipeline_mode = #tpu.pipeline_mode<synchronous>, transform_indices = @transform_5, window_bounds = array<i64: 1, 1>}, {pipeline_mode = #tpu.pipeline_mode<synchronous>, transform_indices = @transform_6, window_bounds = array<i64: 128, 128>}, {pipeline_mode = #tpu.pipeline_mode<synchronous>, transform_indices = @transform_7, window_bounds = array<i64: 1, 128>}, {pipeline_mode = #tpu.pipeline_mode<synchronous>, transform_indices = @transform_8, window_bounds = array<i64: 8, 128>}]} {
    %c0_i32 = arith.constant 0 : i32
    %0 = arith.cmpi eq, %arg0, %c0_i32 : i32
    %1 = arith.extui %0 : i1 to i32
    %c0_i32_0 = arith.constant 0 : i32
    %2 = arith.cmpi ne, %1, %c0_i32_0 : i32
    scf.if %2 {
      %cst_10 = arith.constant 0.000000e+00 : f32
      %13 = vector.broadcast %cst_10 : f32 to vector<8x256xf32>
      %c0_11 = arith.constant 0 : index
      %c0_12 = arith.constant 0 : index
      %14 = vector.load %arg10[%c0_11, %c0_12] : memref<8x256xf32, #tpu.memory_space<vmem>>, vector<8x256xf32>
      tpu.vector_store %arg10[%c0_11, %c0_12], %13 {strides = array<i32>} : memref<8x256xf32, #tpu.memory_space<vmem>>, vector<8x256xf32>,
    } else {
    }
    %c0 = arith.constant 0 : index
    %c0_1 = arith.constant 0 : index
    %3 = vector.load %arg10[%c0, %c0_1] : memref<8x256xf32, #tpu.memory_space<vmem>>, vector<8x256xf32>
    %c0_2 = arith.constant 0 : index
    %c0_3 = arith.constant 0 : index
    %4 = vector.load %arg1[%c0_2, %c0_3] : memref<8x4096xf32, #tpu.memory_space<vmem>>, vector<8x4096xf32>
    %5 = arith.truncf %4 : vector<8x4096xf32> to vector<8x4096xbf16>
    %c0_4 = arith.constant 0 : index
    %c0_5 = arith.constant 0 : index
    %6 = vector.load %arg2[%c0_4, %c0_5] : memref<4096x256xbf16, #tpu.memory_space<vmem>>, vector<4096x256xbf16>
    %cst = arith.constant dense<0.000000e+00> : vector<8x256xf32>
    %7 = tpu.matmul %5, %6, %cst {dimension_numbers = #tpu.dot_dimension_numbers<[1], [0], [0], [1], [0, 0, 1, 1], [], []>} : vector<8x4096xbf16>, vector<4096x256xbf16>, vector<8x256xf32> -> vector<8x256xf32>
    %8 = arith.addf %3, %7 : vector<8x256xf32>
    %c0_6 = arith.constant 0 : index
    %c0_7 = arith.constant 0 : index
    %9 = vector.load %arg10[%c0_6, %c0_7] : memref<8x256xf32, #tpu.memory_space<vmem>>, vector<8x256xf32>
    tpu.vector_store %arg10[%c0_6, %c0_7], %8 {strides = array<i32>} : memref<8x256xf32, #tpu.memory_space<vmem>>, vector<8x256xf32>,
    %c0_i32_8 = arith.constant 0 : i32
    %10 = arith.cmpi eq, %arg0, %c0_i32_8 : i32
    %11 = arith.extui %10 : i1 to i32
    %c0_i32_9 = arith.constant 0 : i32
    %12 = arith.cmpi ne, %11, %c0_i32_9 : i32
    scf.if %12 {
      %c0_10 = arith.constant 0 : index
      %c0_11 = arith.constant 0 : index
      %13 = vector.load %arg10[%c0_10, %c0_11] : memref<8x256xf32, #tpu.memory_space<vmem>>, vector<8x256xf32>
      %c0_12 = arith.constant 0 : index
      %c0_13 = arith.constant 0 : index
      %14 = vector.load %arg3[%c0_12, %c0_13] : memref<1x256xf32, #tpu.memory_space<vmem>>, vector<1x256xf32>
      %15 = vector.broadcast %14 : vector<1x256xf32> to vector<8x256xf32>
      %16 = arith.addf %13, %15 : vector<8x256xf32>
      %c0_14 = arith.constant 0 : index
      %c0_15 = arith.constant 0 : index
      %17 = vector.load %arg4[%c0_14, %c0_15] : memref<256x128xf32, #tpu.memory_space<vmem>>, vector<256x128xf32>
      %cst_16 = arith.constant dense<0.000000e+00> : vector<8x128xf32>
      %18 = tpu.matmul %16, %17, %cst_16 {dimension_numbers = #tpu.dot_dimension_numbers<[1], [0], [0], [1], [0, 0, 1, 1], [], []>} : vector<8x256xf32>, vector<256x128xf32>, vector<8x128xf32> -> vector<8x128xf32>
      %c0_17 = arith.constant 0 : index
      %c0_18 = arith.constant 0 : index
      %19 = vector.load %arg5[%c0_17, %c0_18] : memref<1x128xf32, #tpu.memory_space<vmem>>, vector<1x128xf32>
      %20 = vector.broadcast %19 : vector<1x128xf32> to vector<8x128xf32>
      %21 = arith.addf %18, %20 : vector<8x128xf32>
      %cst_19 = arith.constant 0.000000e+00 : f32
      %22 = vector.broadcast %cst_19 : f32 to vector<8x128xf32>
      %23 = arith.cmpf oge, %21, %22 : vector<8x128xf32>
      %c0_20 = arith.constant 0 : index
      %c0_21 = arith.constant 0 : index
      %24 = vector.load %arg6[%c0_20, %c0_21] : memref<1x1xf32, #tpu.memory_space<vmem>>, vector<1x1xf32>
      %25 = vector.broadcast %24 : vector<1x1xf32> to vector<8x128xf32>
      %26 = arith.mulf %21, %25 : vector<8x128xf32>
      %27 = arith.select %23, %21, %26 : vector<8x128xi1>, vector<8x128xf32>
      %c0_22 = arith.constant 0 : index
      %c0_23 = arith.constant 0 : index
      %28 = vector.load %arg7[%c0_22, %c0_23] : memref<128x128xf32, #tpu.memory_space<vmem>>, vector<128x128xf32>
      %cst_24 = arith.constant dense<0.000000e+00> : vector<8x128xf32>
      %29 = tpu.matmul %27, %28, %cst_24 {dimension_numbers = #tpu.dot_dimension_numbers<[1], [0], [0], [1], [0, 0, 1, 1], [], []>} : vector<8x128xf32>, vector<128x128xf32>, vector<8x128xf32> -> vector<8x128xf32>
      %c0_25 = arith.constant 0 : index
      %c0_26 = arith.constant 0 : index
      %30 = vector.load %arg8[%c0_25, %c0_26] : memref<1x128xf32, #tpu.memory_space<vmem>>, vector<1x128xf32>
      %31 = vector.broadcast %30 : vector<1x128xf32> to vector<8x128xf32>
      %32 = arith.addf %29, %31 : vector<8x128xf32>
      %33 = math.tanh %32 : vector<8x128xf32>
      %c0_27 = arith.constant 0 : index
      %c0_28 = arith.constant 0 : index
      %34 = vector.load %arg9[%c0_27, %c0_28] : memref<8x128xf32, #tpu.memory_space<vmem>>, vector<8x128xf32>
      tpu.vector_store %arg9[%c0_27, %c0_28], %33 {strides = array<i32>} : memref<8x128xf32, #tpu.memory_space<vmem>>, vector<8x128xf32>,
    } else {
    }
    return
  }
  func.func @transform_0(%arg0: i32) -> (i32, i32) {
    %c0_i32 = arith.constant 0 : i32
    %c0_i32_0 = arith.constant 0 : i32
    return %c0_i32, %arg0 : i32, i32
  }
  func.func @transform_1(%arg0: i32) -> (i32, i32) {
    %c0_i32 = arith.constant 0 : i32
    %c0_i32_0 = arith.constant 0 : i32
    return %arg0, %c0_i32 : i32, i32
  }
  func.func @transform_2(%arg0: i32) -> (i32, i32) {
    %c0_i32 = arith.constant 0 : i32
    %c0_i32_0 = arith.constant 0 : i32
    %c0_i32_1 = arith.constant 0 : i32
    return %c0_i32, %c0_i32_0 : i32, i32
  }
  func.func @transform_3(%arg0: i32) -> (i32, i32) {
    %c0_i32 = arith.constant 0 : i32
    %c0_i32_0 = arith.constant 0 : i32
    %c0_i32_1 = arith.constant 0 : i32
    return %c0_i32, %c0_i32_0 : i32, i32
  }
  func.func @transform_4(%arg0: i32) -> (i32, i32) {
    %c0_i32 = arith.constant 0 : i32
    %c0_i32_0 = arith.constant 0 : i32
    %c0_i32_1 = arith.constant 0 : i32
    return %c0_i32, %c0_i32_0 : i32, i32
  }
  func.func @transform_5(%arg0: i32) -> (i32, i32) {
    %c0_i32 = arith.constant 0 : i32
    %c0_i32_0 = arith.constant 0 : i32
    %c0_i32_1 = arith.constant 0 : i32
    return %c0_i32, %c0_i32_0 : i32, i32
  }
  func.func @transform_6(%arg0: i32) -> (i32, i32) {
    %c0_i32 = arith.constant 0 : i32
    %c0_i32_0 = arith.constant 0 : i32
    %c0_i32_1 = arith.constant 0 : i32
    return %c0_i32, %c0_i32_0 : i32, i32
  }
  func.func @transform_7(%arg0: i32) -> (i32, i32) {
    %c0_i32 = arith.constant 0 : i32
    %c0_i32_0 = arith.constant 0 : i32
    %c0_i32_1 = arith.constant 0 : i32
    return %c0_i32, %c0_i32_0 : i32, i32
  }
  func.func @transform_8(%arg0: i32) -> (i32, i32) {
    %c0_i32 = arith.constant 0 : i32
    %c0_i32_0 = arith.constant 0 : i32
    %c0_i32_1 = arith.constant 0 : i32
    return %c0_i32, %c0_i32_0 : i32, i32
  }
}

</mosaic_0001>

<bundles_post_ra>
// kernel: unet_regressor_forward.1
= control target key start
LH: loop header
LB: loop body
LE: loop exit
PB: predicated region body
PF: predicated region fallthrough
CT: control target
= control target key end

     0   :  { %s6008_s0 = inlined_call_operand.vmem [shape: f32[8,4096], index: 0, kind: input, shape index: {}]   ;;  %s6009_s1 = inlined_call_operand.hbm [shape: bf16[4096,256], index: 1, kind: input, shape index: {}]   ;;  %s6010_s2 = inlined_call_operand.hbm [shape: f32[1,256], index: 2, kind: input, shape index: {}]   ;;  %s6011_s3 = inlined_call_operand.hbm [shape: f32[256,128], index: 3, kind: input, shape index: {}]   ;;  %s6012_s4 = inlined_call_operand.hbm [shape: f32[1,128], index: 4, kind: input, shape index: {}]   ;;  %s6013_s5 = inlined_call_operand.<no memory space> [shape: f32[1,1], index: 5, kind: input, shape index: {}]   ;;  %s6014_s6 = inlined_call_operand.hbm [shape: f32[128,128], index: 6, kind: input, shape index: {}]   ;;  %s6015_s7 = inlined_call_operand.hbm [shape: f32[1,128], index: 7, kind: input, shape index: {}]   ;;  %s6016_s8 = inlined_call_operand.vmem [shape: f32[8,128], index: 8, kind: output, shape index: {}]  }
   0x1   :  { %v13_v0 = vstv %s6013_s5 }
   0x2   :  { %14 = vst [vmem:[#allocation3] sm:$0x1] %v13_v0 }
   0x3   :  { %15 = vsyncpa [#allocation5], 0 }
   0x4   :  { %16 = vsyncpa [#allocation7], 0 }
   0x5   :  { %17 = vsyncpa [#allocation10], 0 }
   0x6   :  { %18 = vsyncpa [#allocation13], 0  ;;  %s5736_s29 = smov [#allocation6]   ;;  %s5737_s9 = smov [#allocation9]  }
   0x7   :  { %s39_s30 = sshll.u32 %s5736_s29, 4  ;;  %s61_s10 = sshll.u32 %s5737_s9, 4  ;;  %s40_s30 = int_to_ptr.vmem [resolvable:$true] %s39_s30  ;;  %s62_s10 = int_to_ptr.vmem [resolvable:$true] %s61_s10 }
   0x8   :  { %s5596_s13 = scalar_lea.hbm %s6010_s2, 32 }
   0x9   :  { %p5597_p0 = scmp.ne.s32.totalorder %s6010_s2, %s5596_s13  ;;  %p5600_p1 = scmp.lt.u32.totalorder %s5596_s13, %s6010_s2 }
   0xb   :  { %p5602_p2 = pnand %p5600_p1, %p5597_p0 }
   0xd   :  { %5605 = shalt.err (!%p5602_p2)
}
   0xe   :  { %s5606_s17 = scalar_lea.vmem %s40_s30, 32  ;;  %p5611_p4 = scmp.lt.s32.totalorder %s40_s30, %s40_s30 }
   0xf   :  { %p5607_p3 = scmp.ne.s32.totalorder %s40_s30, %s5606_s17  ;;  %p5612_p5 = scmp.lt.s32.totalorder %s5606_s17, %s5606_s17 }
  0x11   :  { %p5613_p6 = por %p5612_p5, %p5611_p4 }
  0x13   :  { %p5614_p7 = pnand %p5613_p6, %p5607_p3 }
  0x15   :  { %5617 = shalt.err (!%p5614_p7)
}
  0x16   :  { %42 = dma.hbm_to_vmem [thread:$0]  %s6010_s2, 32, %s40_s30, [#allocation7]  }
  0x17   :  { %s5618_s22 = scalar_lea.hbm %s6012_s4, 16 }
  0x18   :  { %p5619_p8 = scmp.ne.s32.totalorder %s6012_s4, %s5618_s22  ;;  %p5622_p9 = scmp.lt.u32.totalorder %s5618_s22, %s6012_s4 }
  0x1a   :  { %p5624_p10 = pnand %p5622_p9, %p5619_p8 }
  0x1c   :  { %5627 = shalt.err (!%p5624_p10)
}
  0x1d   :  { %s5628_s27 = scalar_lea.vmem %s62_s10, 16  ;;  %s5632_s28 = scalar_lea.vmem %s62_s10, 32 }
  0x1e   :  { %p5629_p11 = scmp.ne.s32.totalorder %s62_s10, %s5628_s27  ;;  %p5633_p12 = scmp.lt.s32.totalorder %s62_s10, %s62_s10 }
  0x1f   :  { %p5634_p13 = scmp.lt.s32.totalorder %s5632_s28, %s5628_s27 }
  0x21   :  { %p5635_p0 = por %p5634_p13, %p5633_p12 }
  0x23   :  { %p5636_p1 = pnand %p5635_p0, %p5629_p11 }
  0x25   :  { %5639 = shalt.err (!%p5636_p1)
}
  0x26   :  { %64 = dma.hbm_to_vmem [thread:$0]  %s6012_s4, 16, %s62_s10, [#allocation10]  }
  0x27   :  { %s5738_s30 = smov [#allocation4]   ;;  %s5640_s13 = scalar_lea.hbm %s6009_s1, 65536 }
  0x28   :  { %s26_s9 = sshll.u32 %s5738_s30, 4  ;;  %p5641_p2 = scmp.ne.s32.totalorder %s6009_s1, %s5640_s13  ;;  %s27_s9 = int_to_ptr.vmem [resolvable:$true] %s26_s9 }
  0x29   :  { %p5644_p3 = scmp.lt.u32.totalorder %s5640_s13, %s6009_s1 }
  0x2b   :  { %p5646_p4 = pnand %p5644_p3, %p5641_p2 }
  0x2d   :  { %5649 = shalt.err (!%p5646_p4)
}
  0x2e   :  { %s5650_s17 = scalar_lea.vmem %s27_s9, 65536  ;;  %p5655_p6 = scmp.lt.s32.totalorder %s27_s9, %s27_s9 }
  0x2f   :  { %p5651_p5 = scmp.ne.s32.totalorder %s27_s9, %s5650_s17  ;;  %p5656_p7 = scmp.lt.s32.totalorder %s5650_s17, %s5650_s17 }
  0x31   :  { %p5657_p8 = por %p5656_p7, %p5655_p6 }
  0x33   :  { %p5658_p9 = pnand %p5657_p8, %p5651_p5 }
  0x35   :  { %5661 = shalt.err (!%p5658_p9)
}
  0x36   :  { %s5739_s4 = smov 128   ;;  %s5740_s10 = smov 8  }
  0x37   :  { %32 = dma.hbm_to_vmem [thread:$0]  %s6009_s1, 65536, %s27_s9, [#allocation5], %s5739_s4, %s5739_s4, %s5740_s10  }
  0x38   :  { %s5741_s20 = smov [#allocation8]   ;;  %s5742_s22 = smov [#allocation11]  }
  0x39   :  { %s48_s21 = sshll.u32 %s5741_s20, 4  ;;  %s72_s23 = sshll.u32 %s5742_s22, 4  ;;  %s49_s21 = int_to_ptr.vmem [resolvable:$true] %s48_s21  ;;  %s73_s23 = int_to_ptr.vmem [resolvable:$true] %s72_s23 }
  0x3a   :  { %s5662_s26 = scalar_lea.hbm %s6011_s3, 4096 }
  0x3b   :  { %p5663_p10 = scmp.ne.s32.totalorder %s6011_s3, %s5662_s26  ;;  %p5666_p11 = scmp.lt.u32.totalorder %s5662_s26, %s6011_s3 }
  0x3d   :  { %p5668_p12 = pnand %p5666_p11, %p5663_p10 }
  0x3f   :  { %5671 = shalt.err (!%p5668_p12)
}
  0x40   :  { %s5672_s1 = scalar_lea.vmem %s49_s21, 4096  ;;  %p5677_p0 = scmp.lt.s32.totalorder %s49_s21, %s49_s21 }
  0x41   :  { %p5673_p13 = scmp.ne.s32.totalorder %s49_s21, %s5672_s1  ;;  %p5678_p1 = scmp.lt.s32.totalorder %s5672_s1, %s5672_s1 }
  0x43   :  { %p5679_p2 = por %p5678_p1, %p5677_p0 }
  0x45   :  { %p5680_p3 = pnand %p5679_p2, %p5673_p13 }
  0x47   :  { %5683 = shalt.err (!%p5680_p3)
}
  0x48   :  { %54 = dma.hbm_to_vmem [thread:$0]  %s6011_s3, 4096, %s49_s21, [#allocation7], %s5739_s4, %s5739_s4, %s5740_s10  }
  0x49   :  { %s5684_s13 = scalar_lea.hbm %s6014_s6, 2048 }
  0x4a   :  { %p5685_p4 = scmp.ne.s32.totalorder %s6014_s6, %s5684_s13  ;;  %p5688_p5 = scmp.lt.u32.totalorder %s5684_s13, %s6014_s6 }
  0x4c   :  { %p5690_p6 = pnand %p5688_p5, %p5685_p4 }
  0x4e   :  { %5693 = shalt.err (!%p5690_p6)
}
  0x4f   :  { %s5694_s17 = scalar_lea.vmem %s73_s23, 2048  ;;  %p5699_p8 = scmp.lt.s32.totalorder %s73_s23, %s73_s23 }
  0x50   :  { %p5695_p7 = scmp.ne.s32.totalorder %s73_s23, %s5694_s17  ;;  %p5700_p9 = scmp.lt.s32.totalorder %s5694_s17, %s5694_s17 }
  0x52   :  { %p5701_p10 = por %p5700_p9, %p5699_p8 }
  0x54   :  { %p5702_p11 = pnand %p5701_p10, %p5695_p7 }
  0x56   :  { %5705 = shalt.err (!%p5702_p11)
}
  0x57   :  { %78 = dma.hbm_to_vmem [thread:$0]  %s6014_s6, 2048, %s73_s23, [#allocation10], %s5739_s4, %s5739_s4, %s5740_s10  }
  0x58   :  { %s5743_s19 = smov [#allocation12]   ;;  %s5706_s24 = scalar_lea.hbm %s6015_s7, 16 }
  0x59   :  { %s85_s20 = sshll.u32 %s5743_s19, 4  ;;  %p5707_p12 = scmp.ne.s32.totalorder %s6015_s7, %s5706_s24  ;;  %s86_s20 = int_to_ptr.vmem [resolvable:$true] %s85_s20 }
  0x5a   :  { %p5710_p13 = scmp.lt.u32.totalorder %s5706_s24, %s6015_s7 }
  0x5c   :  { %p5712_p0 = pnand %p5710_p13, %p5707_p12 }
  0x5e   :  { %5715 = shalt.err (!%p5712_p0)
}
  0x5f   :  { %s5716_s2 = scalar_lea.vmem %s86_s20, 16  ;;  %s5720_s6 = scalar_lea.vmem %s86_s20, 32 }
  0x60   :  { %p5717_p1 = scmp.ne.s32.totalorder %s86_s20, %s5716_s2  ;;  %p5721_p2 = scmp.lt.s32.totalorder %s86_s20, %s86_s20 }
  0x61   :  { %p5722_p3 = scmp.lt.s32.totalorder %s5720_s6, %s5716_s2 }
  0x63   :  { %p5723_p4 = por %p5722_p3, %p5721_p2 }
  0x65   :  { %p5724_p5 = pnand %p5723_p4, %p5717_p1 }
  0x67   :  { %5727 = shalt.err (!%p5724_p5)
}
  0x68   :  { %88 = dma.hbm_to_vmem [thread:$0]  %s6015_s7, 16, %s86_s20, [#allocation13]  }
  0x69   :  { %5728 = dma.done.wait [#allocation5], 65536  }
  0x6a   :  { %5729 = vsyncadd [#allocation5], 4294901760 }
  0x6b   :  { %5730 = dma.done.wait [#allocation7], 4128  }
  0x6c   :  { %5731 = vsyncadd [#allocation7], 4294963168 }
  0x6d   :  { %5732 = dma.done.wait [#allocation10], 2064  }
  0x6e   :  { %5733 = vsyncadd [#allocation10], 4294965232 }
  0x6f   :  { %5734 = dma.done.wait [#allocation13], 16  }
  0x70   :  { %5735 = vsyncadd [#allocation13], 4294967280  ;;  %v4826_v1 = vld [vmem:[#allocation4 + $0x4] ss:$8 sps:$4 sm:$0xff]   ;;  %v4830_v3 = vld [vmem:[#allocation4] ss:$8 sps:$4 sm:$0xff]  }
  0x71   :  { %v4828_v2 = vld [vmem:[#allocation4 + $0x104] ss:$8 sps:$4 sm:$0xff]   ;;  %3251 = vmatprep.subr.bf16.mxu0 %v4826_v1  ;;  %v4831_v4 = vld [vmem:[#allocation4 + $0x100] ss:$8 sps:$4 sm:$0xff]   ;;  %v4832_v5 = vld [vmem:[#allocation4 + $0x14] ss:$8 sps:$4 sm:$0xff]  }
  0x72   :  { %3292 = vmatprep.subr.bf16.mxu1 %v4828_v2  ;;  %3252 = vmatpush1.bf16.msra.mxu0 %v4830_v3  ;;  %v4834_v6 = vld [vmem:[#allocation4 + $0x114] ss:$8 sps:$4 sm:$0xff]   ;;  %v4836_v7 = vld [vmem:[#allocation4 + $0x10] ss:$8 sps:$4 sm:$0xff]   ;;  %v4838_v9 = vld [vmem:[#allocation4 + $0x24] ss:$8 sps:$4 sm:$0xff]  }
  0x73   :  { %3293 = vmatpush1.bf16.msra.mxu1 %v4831_v4  ;;  %3253 = vmatprep.subr.bf16.mxu0 %v4832_v5  ;;  %v4837_v8 = vld [vmem:[#allocation4 + $0x110] ss:$8 sps:$4 sm:$0xff]   ;;  %v4840_v10 = vld [vmem:[#allocation4 + $0x124] ss:$8 sps:$4 sm:$0xff]   ;;  %v4842_v11 = vld [vmem:[#allocation4 + $0x20] ss:$8 sps:$4 sm:$0xff]  }
  0x74   :  { %3294 = vmatprep.subr.bf16.mxu1 %v4834_v6  ;;  %v4843_v12 = vld [vmem:[#allocation4 + $0x120] ss:$8 sps:$4 sm:$0xff]   ;;  %v4844_v13 = vld [vmem:[#allocation4 + $0x34] ss:$8 sps:$4 sm:$0xff]   ;;  %v4848_v15 = vld [vmem:[#allocation4 + $0x30] ss:$8 sps:$4 sm:$0xff]  }
  0x75   :  { %v4846_v14 = vld [vmem:[#allocation4 + $0x134] ss:$8 sps:$4 sm:$0xff]   ;;  %v4849_v16 = vld [vmem:[#allocation4 + $0x130] ss:$8 sps:$4 sm:$0xff]   ;;  %v4850_v17 = vld [vmem:[#allocation4 + $0x44] ss:$8 sps:$4 sm:$0xff]  }
  0x76   :  { %3254 = vmatpush1.bf16.msra.mxu0 %v4836_v7  ;;  %v4852_v18 = vld [vmem:[#allocation4 + $0x144] ss:$8 sps:$4 sm:$0xff]   ;;  %v4854_v19 = vld [vmem:[#allocation4 + $0x40] ss:$8 sps:$4 sm:$0xff]   ;;  %v4856_v21 = vld [vmem:[#allocation4 + $0x54] ss:$8 sps:$4 sm:$0xff]  }
  0x77   :  { %3295 = vmatpush1.bf16.msra.mxu1 %v4837_v8  ;;  %3255 = vmatprep.subr.bf16.mxu0 %v4838_v9  ;;  %v4855_v20 = vld [vmem:[#allocation4 + $0x140] ss:$8 sps:$4 sm:$0xff]   ;;  %v4858_v22 = vld [vmem:[#allocation4 + $0x154] ss:$8 sps:$4 sm:$0xff]   ;;  %v4860_v23 = vld [vmem:[#allocation4 + $0x50] ss:$8 sps:$4 sm:$0xff]  }
  0x78   :  { %3296 = vmatprep.subr.bf16.mxu1 %v4840_v10  ;;  %v4861_v24 = vld [vmem:[#allocation4 + $0x150] ss:$8 sps:$4 sm:$0xff]   ;;  %v4862_v25 = vld [vmem:[#allocation4 + $0x64] ss:$8 sps:$4 sm:$0xff]   ;;  %v4866_v27 = vld [vmem:[#allocation4 + $0x60] ss:$8 sps:$4 sm:$0xff]  }
  0x79   :  { %v4864_v26 = vld [vmem:[#allocation4 + $0x164] ss:$8 sps:$4 sm:$0xff]   ;;  %v4867_v28 = vld [vmem:[#allocation4 + $0x160] ss:$8 sps:$4 sm:$0xff]   ;;  %v4868_v29 = vld [vmem:[#allocation4 + $0x74] ss:$8 sps:$4 sm:$0xff]  }
  0x7a   :  { %3256 = vmatpush1.bf16.msra.mxu0 %v4842_v11  ;;  %v4870_v30 = vld [vmem:[#allocation4 + $0x174] ss:$8 sps:$4 sm:$0xff]   ;;  %v4872_v31 = vld [vmem:[#allocation4 + $0x70] ss:$8 sps:$4 sm:$0xff]   ;;  %v4874_v33 = vld [vmem:[#allocation4 + $0x84] ss:$8 sps:$4 sm:$0xff]  }
  0x7b   :  { %3297 = vmatpush1.bf16.msra.mxu1 %v4843_v12  ;;  %3257 = vmatprep.subr.bf16.mxu0 %v4844_v13  ;;  %v4873_v32 = vld [vmem:[#allocation4 + $0x170] ss:$8 sps:$4 sm:$0xff]   ;;  %v4876_v34 = vld [vmem:[#allocation4 + $0x184] ss:$8 sps:$4 sm:$0xff]   ;;  %v4878_v35 = vld [vmem:[#allocation4 + $0x80] ss:$8 sps:$4 sm:$0xff]  }
  0x7c   :  { %3298 = vmatprep.subr.bf16.mxu1 %v4846_v14  ;;  %v4879_v36 = vld [vmem:[#allocation4 + $0x180] ss:$8 sps:$4 sm:$0xff]   ;;  %v4880_v37 = vld [vmem:[#allocation4 + $0x94] ss:$8 sps:$4 sm:$0xff]   ;;  %v4884_v39 = vld [vmem:[#allocation4 + $0x90] ss:$8 sps:$4 sm:$0xff]  }
  0x7d   :  { %v4882_v38 = vld [vmem:[#allocation4 + $0x194] ss:$8 sps:$4 sm:$0xff]   ;;  %v4885_v40 = vld [vmem:[#allocation4 + $0x190] ss:$8 sps:$4 sm:$0xff]   ;;  %v4886_v41 = vld [vmem:[#allocation4 + $0xa4] ss:$8 sps:$4 sm:$0xff]  }
  0x7e   :  { %3258 = vmatpush1.bf16.msra.mxu0 %v4848_v15  ;;  %v4888_v42 = vld [vmem:[#allocation4 + $0x1a4] ss:$8 sps:$4 sm:$0xff]   ;;  %v4890_v43 = vld [vmem:[#allocation4 + $0xa0] ss:$8 sps:$4 sm:$0xff]   ;;  %v4892_v45 = vld [vmem:[#allocation4 + $0xb4] ss:$8 sps:$4 sm:$0xff]  }
  0x7f   :  { %3299 = vmatpush1.bf16.msra.mxu1 %v4849_v16  ;;  %3259 = vmatprep.subr.bf16.mxu0 %v4850_v17  ;;  %v4891_v44 = vld [vmem:[#allocation4 + $0x1a0] ss:$8 sps:$4 sm:$0xff]   ;;  %v4894_v46 = vld [vmem:[#allocation4 + $0x1b4] ss:$8 sps:$4 sm:$0xff]   ;;  %v4896_v48 = vld [vmem:[#allocation4 + $0xb0] ss:$8 sps:$4 sm:$0xff]  }
  0x80   :  { %3300 = vmatprep.subr.bf16.mxu1 %v4852_v18  ;;  %v116_v47 = vld [vmem:[%s6008_s0 + $0x8] sm:$0xff]  ;;  %v4897_v49 = vld [vmem:[#allocation4 + $0x1b0] ss:$8 sps:$4 sm:$0xff]   ;;  %v4904_v57 = vld [vmem:[#allocation4 + $0xd4] ss:$8 sps:$4 sm:$0xff]   ;;  %vm5746_vm0 = vmmov 0  }
  0x81   :  { %v148_v50 = vpack.c.bf16 %v116_v47, %v116_v47  ;;  %v118_v51 = vld [vmem:[%s6008_s0 + $0x18] sm:$0xff]  ;;  %v4898_v52 = vld [vmem:[#allocation4 + $0xc4] ss:$8 sps:$4 sm:$0xff]   ;;  %v4902_v55 = vld [vmem:[#allocation4 + $0xc0] ss:$8 sps:$4 sm:$0xff]  }
  0x82   :  { %3260 = vmatpush1.bf16.msra.mxu0 %v4854_v19  ;;  %v150_v53 = vpack.c.bf16 %v118_v51, %v118_v51  ;;  %v4900_v54 = vld [vmem:[#allocation4 + $0x1c4] ss:$8 sps:$4 sm:$0xff]   ;;  %v4903_v56 = vld [vmem:[#allocation4 + $0x1c0] ss:$8 sps:$4 sm:$0xff]   ;;  %v4906_v58 = vld [vmem:[#allocation4 + $0x1d4] ss:$8 sps:$4 sm:$0xff]  }
  0x83   :  { %3301 = vmatpush1.bf16.msra.mxu1 %v4855_v20  ;;  %3261 = vmatprep.subr.bf16.mxu0 %v4856_v21  ;;  %v4908_v59 = vld [vmem:[#allocation4 + $0xd0] ss:$8 sps:$4 sm:$0xff]   ;;  %v4910_v61 = vld [vmem:[#allocation4 + $0xe4] ss:$8 sps:$4 sm:$0xff]   ;;  %v4914_v63 = vld [vmem:[#allocation4 + $0xe0] ss:$8 sps:$4 sm:$0xff]  }
  0x84   :  { %3302 = vmatprep.subr.bf16.mxu1 %v4858_v22  ;;  %3283 = vmatprep.mubr.bf16.mxu0 %v148_v50  ;;  %v4909_v60 = vld [vmem:[#allocation4 + $0x1d0] ss:$8 sps:$4 sm:$0xff]   ;;  %v4912_v62 = vld [vmem:[#allocation4 + $0x1e4] ss:$8 sps:$4 sm:$0xff]   ;;  %v4915_v0 = vld [vmem:[#allocation4 + $0x1e0] ss:$8 sps:$4 sm:$0xff]  }
  0x85   :  { %3324 = vmatprep.mubr.bf16.mxu1 %v150_v53  ;;  %v4916_v1 = vld [vmem:[#allocation4 + $0xf4] ss:$8 sps:$4 sm:$0xff]   ;;  %v4920_v3 = vld [vmem:[#allocation4 + $0xf0] ss:$8 sps:$4 sm:$0xff]   ;;  %v4924_v7 = vld [vmem:[#allocation4 + $0x204] ss:$8 sps:$4 sm:$0xff]  }
  0x86   :  { %3262 = vmatpush1.bf16.msra.mxu0 %v4860_v23  ;;  %v4918_v2 = vld [vmem:[#allocation4 + $0x1f4] ss:$8 sps:$4 sm:$0xff]   ;;  %v4921_v4 = vld [vmem:[#allocation4 + $0x1f0] ss:$8 sps:$4 sm:$0xff]   ;;  %v4927_v8 = vld [vmem:[#allocation4 + $0x304] ss:$8 sps:$4 sm:$0xff]  }
  0x87   :  { %3303 = vmatpush1.bf16.msra.mxu1 %v4861_v24  ;;  %3263 = vmatprep.subr.bf16.mxu0 %v4862_v25  ;;  %v115_v5 = vld [vmem:[%s6008_s0] sm:$0xff]  ;;  %v117_v6 = vld [vmem:[%s6008_s0 + $0x10] sm:$0xff] }
  0x88   :  { %3304 = vmatprep.subr.bf16.mxu1 %v4864_v26  ;;  %v147_v9 = vpack.c.bf16 %v115_v5, %v115_v5  ;;  %v149_v10 = vpack.c.bf16 %v117_v6, %v117_v6  ;;  %v4922_v11 = vld [vmem:[#allocation4 + $0x200] ss:$8 sps:$4 sm:$0xff]   ;;  %v4930_v13 = vld [vmem:[#allocation4 + $0x214] ss:$8 sps:$4 sm:$0xff]   ;;  %v4928_v15 = vld [vmem:[#allocation4 + $0x210] ss:$8 sps:$4 sm:$0xff]  }
  0x89   :  { %v4925_v12 = vld [vmem:[#allocation4 + $0x300] ss:$8 sps:$4 sm:$0xff]   ;;  %v4933_v14 = vld [vmem:[#allocation4 + $0x314] ss:$8 sps:$4 sm:$0xff]   ;;  %v4931_v16 = vld [vmem:[#allocation4 + $0x310] ss:$8 sps:$4 sm:$0xff]  }
  0x8a   :  { %3264 = vmatpush1.bf16.msra.mxu0 %v4866_v27  ;;  %v4936_v17 = vld [vmem:[#allocation4 + $0x224] ss:$8 sps:$4 sm:$0xff]   ;;  %v4934_v19 = vld [vmem:[#allocation4 + $0x220] ss:$8 sps:$4 sm:$0xff]   ;;  %v4942_v21 = vld [vmem:[#allocation4 + $0x234] ss:$8 sps:$4 sm:$0xff]  }
  0x8b   :  { %3305 = vmatpush1.bf16.msra.mxu1 %v4867_v28  ;;  %3265 = vmatprep.subr.bf16.mxu0 %v4868_v29  ;;  %v4939_v18 = vld [vmem:[#allocation4 + $0x324] ss:$8 sps:$4 sm:$0xff]   ;;  %v4937_v20 = vld [vmem:[#allocation4 + $0x320] ss:$8 sps:$4 sm:$0xff]   ;;  %v4945_v22 = vld [vmem:[#allocation4 + $0x334] ss:$8 sps:$4 sm:$0xff]  }
  0x8c   :  { %3306 = vmatprep.subr.bf16.mxu1 %v4870_v30  ;;  %v4940_v23 = vld [vmem:[#allocation4 + $0x230] ss:$8 sps:$4 sm:$0xff]   ;;  %v4948_v25 = vld [vmem:[#allocation4 + $0x244] ss:$8 sps:$4 sm:$0xff]   ;;  %v4946_v27 = vld [vmem:[#allocation4 + $0x240] ss:$8 sps:$4 sm:$0xff]  }
  0x8d   :  { %v4943_v24 = vld [vmem:[#allocation4 + $0x330] ss:$8 sps:$4 sm:$0xff]   ;;  %v4951_v26 = vld [vmem:[#allocation4 + $0x344] ss:$8 sps:$4 sm:$0xff]   ;;  %v4949_v28 = vld [vmem:[#allocation4 + $0x340] ss:$8 sps:$4 sm:$0xff]  }
  0x8e   :  { %3266 = vmatpush1.bf16.msra.mxu0 %v4872_v31  ;;  %v4954_v29 = vld [vmem:[#allocation4 + $0x254] ss:$8 sps:$4 sm:$0xff]   ;;  %v4952_v31 = vld [vmem:[#allocation4 + $0x250] ss:$8 sps:$4 sm:$0xff]   ;;  %v4970_v47 = vld [vmem:[#allocation4 + $0x280] ss:$8 sps:$4 sm:$0xff]  }
  0x8f   :  { %3307 = vmatpush1.bf16.msra.mxu1 %v4873_v32  ;;  %3267 = vmatprep.subr.bf16.mxu0 %v4874_v33  ;;  %v4957_v30 = vld [vmem:[#allocation4 + $0x354] ss:$8 sps:$4 sm:$0xff]   ;;  %v4955_v32 = vld [vmem:[#allocation4 + $0x350] ss:$8 sps:$4 sm:$0xff]   ;;  %v4960_v33 = vld [vmem:[#allocation4 + $0x264] ss:$8 sps:$4 sm:$0xff]  }
  0x90   :  { %3308 = vmatprep.subr.bf16.mxu1 %v4876_v34  ;;  %v4963_v34 = vld [vmem:[#allocation4 + $0x364] ss:$8 sps:$4 sm:$0xff]   ;;  %v4981_v50 = vld [vmem:[#allocation4 + $0x394] ss:$8 sps:$4 sm:$0xff]   ;;  %v4976_v51 = vld [vmem:[#allocation4 + $0x290] ss:$8 sps:$4 sm:$0xff]  }
  0x91   :  { %v4984_v53 = vld [vmem:[#allocation4 + $0x2a4] ss:$8 sps:$4 sm:$0xff]  }
  0x92   :  { %3268 = vmatpush1.bf16.msra.mxu0 %v4878_v35  ;;  %v120_v35 = vld [vmem:[%s6008_s0 + $0x28] sm:$0xff] }
  0x93   :  { %3309 = vmatpush1.bf16.msra.mxu1 %v4879_v36  ;;  %3269 = vmatprep.subr.bf16.mxu0 %v4880_v37  ;;  %v4958_v36 = vld [vmem:[#allocation4 + $0x260] ss:$8 sps:$4 sm:$0xff]   ;;  %v5008_v5 = vld [vmem:[#allocation4 + $0x2e4] ss:$8 sps:$4 sm:$0xff]  }
  0x94   :  { %3310 = vmatprep.subr.bf16.mxu1 %v4882_v38  ;;  %v4961_v37 = vld [vmem:[#allocation4 + $0x360] ss:$8 sps:$4 sm:$0xff]   ;;  %v152_v38 = vpack.c.bf16 %v120_v35, %v120_v35  ;;  %v5011_v6 = vld [vmem:[#allocation4 + $0x3e4] ss:$8 sps:$4 sm:$0xff]   ;;  %v5036_v35 = vld [vmem:[#allocation4 + $0x430] ss:$8 sps:$4 sm:$0xff]  }
  0x96   :  { %3270 = vmatpush1.bf16.msra.mxu0 %v4884_v39  ;;  %v122_v39 = vld [vmem:[%s6008_s0 + $0x38] sm:$0xff] }
  0x97   :  { %3311 = vmatpush1.bf16.msra.mxu1 %v4885_v40  ;;  %3271 = vmatprep.subr.bf16.mxu0 %v4886_v41  ;;  %v4966_v40 = vld [vmem:[#allocation4 + $0x274] ss:$8 sps:$4 sm:$0xff]   ;;  %v154_v41 = vpack.c.bf16 %v122_v39, %v122_v39  ;;  %v5042_v39 = vld [vmem:[#allocation4 + $0x440] ss:$8 sps:$4 sm:$0xff]  }
  0x98   :  { %3312 = vmatprep.subr.bf16.mxu1 %v4888_v42  ;;  %v4969_v42 = vld [vmem:[#allocation4 + $0x374] ss:$8 sps:$4 sm:$0xff]  }
  0x9a   :  { %3272 = vmatpush1.bf16.msra.mxu0 %v4890_v43  ;;  %v4964_v43 = vld [vmem:[#allocation4 + $0x270] ss:$8 sps:$4 sm:$0xff]  }
  0x9b   :  { %3313 = vmatpush1.bf16.msra.mxu1 %v4891_v44  ;;  %3273 = vmatprep.subr.bf16.mxu0 %v4892_v45  ;;  %v4967_v44 = vld [vmem:[#allocation4 + $0x370] ss:$8 sps:$4 sm:$0xff]   ;;  %v4972_v45 = vld [vmem:[#allocation4 + $0x284] ss:$8 sps:$4 sm:$0xff]  }
  0x9c   :  { %3314 = vmatprep.subr.bf16.mxu1 %v4894_v46  ;;  %v4975_v46 = vld [vmem:[#allocation4 + $0x384] ss:$8 sps:$4 sm:$0xff]  }
  0x9e   :  { %3274 = vmatpush1.bf16.msra.mxu0 %v4896_v48  ;;  %v4973_v48 = vld [vmem:[#allocation4 + $0x380] ss:$8 sps:$4 sm:$0xff]  }
  0x9f   :  { %3315 = vmatpush1.bf16.msra.mxu1 %v4897_v49  ;;  %3275 = vmatprep.subr.bf16.mxu0 %v4898_v52  ;;  %v4978_v49 = vld [vmem:[#allocation4 + $0x294] ss:$8 sps:$4 sm:$0xff]   ;;  %v4979_v52 = vld [vmem:[#allocation4 + $0x390] ss:$8 sps:$4 sm:$0xff]  }
  0xa0   :  { %3316 = vmatprep.subr.bf16.mxu1 %v4900_v54  ;;  %v4987_v54 = vld [vmem:[#allocation4 + $0x3a4] ss:$8 sps:$4 sm:$0xff]  }
  0xa2   :  { %3276 = vmatpush1.bf16.msra.mxu0 %v4902_v55  ;;  %v4982_v55 = vld [vmem:[#allocation4 + $0x2a0] ss:$8 sps:$4 sm:$0xff]  }
  0xa3   :  { %3317 = vmatpush1.bf16.msra.mxu1 %v4903_v56  ;;  %3277 = vmatprep.subr.bf16.mxu0 %v4904_v57  ;;  %v4985_v56 = vld [vmem:[#allocation4 + $0x3a0] ss:$8 sps:$4 sm:$0xff]   ;;  %v4990_v57 = vld [vmem:[#allocation4 + $0x2b4] ss:$8 sps:$4 sm:$0xff]  }
  0xa4   :  { %3318 = vmatprep.subr.bf16.mxu1 %v4906_v58  ;;  %v4993_v58 = vld [vmem:[#allocation4 + $0x3b4] ss:$8 sps:$4 sm:$0xff]  }
  0xa6   :  { %3278 = vmatpush1.bf16.msra.mxu0 %v4908_v59  ;;  %v4988_v59 = vld [vmem:[#allocation4 + $0x2b0] ss:$8 sps:$4 sm:$0xff]  }
  0xa7   :  { %3319 = vmatpush1.bf16.msra.mxu1 %v4909_v60  ;;  %3279 = vmatprep.subr.bf16.mxu0 %v4910_v61  ;;  %v4991_v60 = vld [vmem:[#allocation4 + $0x3b0] ss:$8 sps:$4 sm:$0xff]   ;;  %v4996_v61 = vld [vmem:[#allocation4 + $0x2c4] ss:$8 sps:$4 sm:$0xff]  }
  0xa8   :  { %3320 = vmatprep.subr.bf16.mxu1 %v4912_v62  ;;  %v4999_v62 = vld [vmem:[#allocation4 + $0x3c4] ss:$8 sps:$4 sm:$0xff]  }
  0xaa   :  { %3280 = vmatpush1.bf16.msra.mxu0 %v4914_v63  ;;  %v4994_v63 = vld [vmem:[#allocation4 + $0x2c0] ss:$8 sps:$4 sm:$0xff]  }
  0xab   :  { %3321 = vmatpush1.bf16.msra.mxu1 %v4915_v0  ;;  %3281 = vmatprep.subr.bf16.mxu0 %v4916_v1  ;;  %v4997_v0 = vld [vmem:[#allocation4 + $0x3c0] ss:$8 sps:$4 sm:$0xff]   ;;  %v5002_v1 = vld [vmem:[#allocation4 + $0x2d4] ss:$8 sps:$4 sm:$0xff]  }
  0xac   :  { %3322 = vmatprep.subr.bf16.mxu1 %v4918_v2  ;;  %v5005_v2 = vld [vmem:[#allocation4 + $0x3d4] ss:$8 sps:$4 sm:$0xff]  }
  0xae   :  { %3282 = vmatpush1.bf16.msra.mxu0 %v4920_v3  ;;  %v5000_v3 = vld [vmem:[#allocation4 + $0x2d0] ss:$8 sps:$4 sm:$0xff]  }
  0xaf   :  { %3323 = vmatpush1.bf16.msra.mxu1 %v4921_v4  ;;  %3333 = vmatprep.subr.bf16.mxu0 %v4924_v7  ;;  %v5003_v4 = vld [vmem:[#allocation4 + $0x3d0] ss:$8 sps:$4 sm:$0xff]   ;;  %v5006_v7 = vld [vmem:[#allocation4 + $0x2e0] ss:$8 sps:$4 sm:$0xff]  }
  0xb0   :  { %3374 = vmatprep.subr.bf16.mxu1 %v4927_v8  ;;  %v5009_v8 = vld [vmem:[#allocation4 + $0x3e0] ss:$8 sps:$4 sm:$0xff]  }
  0xb1   :  { %3284 = vmatmul.mubr.bf16.vlgmr.msra.gmra.mrb[0].mxu0 %v147_v9  ;;  %v5014_v9 = vld [vmem:[#allocation4 + $0x2f4] ss:$8 sps:$4 sm:$0xff]  }
  0xb2   :  { %3325 = vmatmul.mubr.bf16.vlgmr.msra.gmra.mrb[0].mxu1 %v149_v10  ;;  %3334 = vmatpush1.bf16.msra.mxu0 %v4922_v11  ;;  %v5017_v10 = vld [vmem:[#allocation4 + $0x3f4] ss:$8 sps:$4 sm:$0xff]   ;;  %v5012_v11 = vld [vmem:[#allocation4 + $0x2f0] ss:$8 sps:$4 sm:$0xff]  }
  0xb3   :  { %3375 = vmatpush1.bf16.msra.mxu1 %v4925_v12  ;;  %3335 = vmatprep.subr.bf16.mxu0 %v4930_v13  ;;  %v5015_v12 = vld [vmem:[#allocation4 + $0x3f0] ss:$8 sps:$4 sm:$0xff]   ;;  %v119_v13 = vld [vmem:[%s6008_s0 + $0x20] sm:$0xff] }
  0xb4   :  { %3376 = vmatprep.subr.bf16.mxu1 %v4933_v14  ;;  %3365 = vmatprep.mubr.bf16.mxu0 %v152_v38  ;;  %v121_v14 = vld [vmem:[%s6008_s0 + $0x30] sm:$0xff] }
  0xb5   :  { %3406 = vmatprep.mubr.bf16.mxu1 %v154_v41  ;;  %v5047_v38 = vld [vmem:[#allocation4 + $0x544] ss:$8 sps:$4 sm:$0xff]   ;;  %v5050_v41 = vld [vmem:[#allocation4 + $0x454] ss:$8 sps:$4 sm:$0xff]  }
  0xb6   :  { %3336 = vmatpush1.bf16.msra.mxu0 %v4928_v15  ;;  %v5020_v15 = vld [vmem:[#allocation4 + $0x404] ss:$8 sps:$4 sm:$0xff]  }
  0xb7   :  { %3377 = vmatpush1.bf16.msra.mxu1 %v4931_v16  ;;  %3337 = vmatprep.subr.bf16.mxu0 %v4936_v17  ;;  %v5023_v16 = vld [vmem:[#allocation4 + $0x504] ss:$8 sps:$4 sm:$0xff]   ;;  %v151_v17 = vpack.c.bf16 %v119_v13, %v119_v13 }
  0xb8   :  { %3378 = vmatprep.subr.bf16.mxu1 %v4939_v18  ;;  %v153_v18 = vpack.c.bf16 %v121_v14, %v121_v14  ;;  %v5104_v13 = vld [vmem:[#allocation4 + $0x4e4] ss:$8 sps:$4 sm:$0xff]  }
  0xb9   :  { %v5107_v14 = vld [vmem:[#allocation4 + $0x5e4] ss:$8 sps:$4 sm:$0xff]  }
  0xba   :  { %3338 = vmatpush1.bf16.msra.mxu0 %v4934_v19  ;;  %v5018_v19 = vld [vmem:[#allocation4 + $0x400] ss:$8 sps:$4 sm:$0xff]  }
  0xbb   :  { %3379 = vmatpush1.bf16.msra.mxu1 %v4937_v20  ;;  %3339 = vmatprep.subr.bf16.mxu0 %v4942_v21  ;;  %v5021_v20 = vld [vmem:[#allocation4 + $0x500] ss:$8 sps:$4 sm:$0xff]   ;;  %v5026_v21 = vld [vmem:[#allocation4 + $0x414] ss:$8 sps:$4 sm:$0xff]  }
  0xbc   :  { %3380 = vmatprep.subr.bf16.mxu1 %v4945_v22  ;;  %v5029_v22 = vld [vmem:[#allocation4 + $0x514] ss:$8 sps:$4 sm:$0xff]  }
  0xbe   :  { %3340 = vmatpush1.bf16.msra.mxu0 %v4940_v23  ;;  %v124_v23 = vld [vmem:[%s6008_s0 + $0x48] sm:$0xff] }
  0xbf   :  { %3381 = vmatpush1.bf16.msra.mxu1 %v4943_v24  ;;  %3341 = vmatprep.subr.bf16.mxu0 %v4948_v25  ;;  %v5024_v24 = vld [vmem:[#allocation4 + $0x410] ss:$8 sps:$4 sm:$0xff]  }
  0xc0   :  { %3382 = vmatprep.subr.bf16.mxu1 %v4951_v26  ;;  %v5027_v25 = vld [vmem:[#allocation4 + $0x510] ss:$8 sps:$4 sm:$0xff]   ;;  %v156_v26 = vpack.c.bf16 %v124_v23, %v124_v23  ;;  %v5116_v23 = vld [vmem:[#allocation4 + $0x604] ss:$8 sps:$4 sm:$0xff]  }
  0xc2   :  { %3342 = vmatpush1.bf16.msra.mxu0 %v4946_v27  ;;  %v126_v27 = vld [vmem:[%s6008_s0 + $0x58] sm:$0xff] }
  0xc3   :  { %3383 = vmatpush1.bf16.msra.mxu1 %v4949_v28  ;;  %3343 = vmatprep.subr.bf16.mxu0 %v4954_v29  ;;  %v5032_v28 = vld [vmem:[#allocation4 + $0x424] ss:$8 sps:$4 sm:$0xff]   ;;  %v158_v29 = vpack.c.bf16 %v126_v27, %v126_v27 }
  0xc4   :  { %3384 = vmatprep.subr.bf16.mxu1 %v4957_v30  ;;  %v5035_v30 = vld [vmem:[#allocation4 + $0x524] ss:$8 sps:$4 sm:$0xff]  }
  0xc6   :  { %3344 = vmatpush1.bf16.msra.mxu0 %v4952_v31  ;;  %v5030_v31 = vld [vmem:[#allocation4 + $0x420] ss:$8 sps:$4 sm:$0xff]  }
  0xc7   :  { %3385 = vmatpush1.bf16.msra.mxu1 %v4955_v32  ;;  %3345 = vmatprep.subr.bf16.mxu0 %v4960_v33  ;;  %v5033_v32 = vld [vmem:[#allocation4 + $0x520] ss:$8 sps:$4 sm:$0xff]   ;;  %v5038_v33 = vld [vmem:[#allocation4 + $0x434] ss:$8 sps:$4 sm:$0xff]  }
  0xc8   :  { %3386 = vmatprep.subr.bf16.mxu1 %v4963_v34  ;;  %v5041_v34 = vld [vmem:[#allocation4 + $0x534] ss:$8 sps:$4 sm:$0xff]  }
  0xca   :  { %3346 = vmatpush1.bf16.msra.mxu0 %v4958_v36  ;;  %v5039_v36 = vld [vmem:[#allocation4 + $0x530] ss:$8 sps:$4 sm:$0xff]  }
  0xcb   :  { %3387 = vmatpush1.bf16.msra.mxu1 %v4961_v37  ;;  %3347 = vmatprep.subr.bf16.mxu0 %v4966_v40  ;;  %v5044_v37 = vld [vmem:[#allocation4 + $0x444] ss:$8 sps:$4 sm:$0xff]   ;;  %v5045_v40 = vld [vmem:[#allocation4 + $0x540] ss:$8 sps:$4 sm:$0xff]  }
  0xcc   :  { %3388 = vmatprep.subr.bf16.mxu1 %v4969_v42  ;;  %v5053_v42 = vld [vmem:[#allocation4 + $0x554] ss:$8 sps:$4 sm:$0xff]  }
  0xce   :  { %3348 = vmatpush1.bf16.msra.mxu0 %v4964_v43  ;;  %v5048_v43 = vld [vmem:[#allocation4 + $0x450] ss:$8 sps:$4 sm:$0xff]  }
  0xcf   :  { %3389 = vmatpush1.bf16.msra.mxu1 %v4967_v44  ;;  %3349 = vmatprep.subr.bf16.mxu0 %v4972_v45  ;;  %v5051_v44 = vld [vmem:[#allocation4 + $0x550] ss:$8 sps:$4 sm:$0xff]   ;;  %v5056_v45 = vld [vmem:[#allocation4 + $0x464] ss:$8 sps:$4 sm:$0xff]  }
  0xd0   :  { %3390 = vmatprep.subr.bf16.mxu1 %v4975_v46  ;;  %v5059_v46 = vld [vmem:[#allocation4 + $0x564] ss:$8 sps:$4 sm:$0xff]  }
  0xd2   :  { %3350 = vmatpush1.bf16.msra.mxu0 %v4970_v47  ;;  %v5054_v47 = vld [vmem:[#allocation4 + $0x460] ss:$8 sps:$4 sm:$0xff]  }
  0xd3   :  { %3391 = vmatpush1.bf16.msra.mxu1 %v4973_v48  ;;  %3351 = vmatprep.subr.bf16.mxu0 %v4978_v49  ;;  %v5057_v48 = vld [vmem:[#allocation4 + $0x560] ss:$8 sps:$4 sm:$0xff]   ;;  %v5062_v49 = vld [vmem:[#allocation4 + $0x474] ss:$8 sps:$4 sm:$0xff]  }
  0xd4   :  { %3392 = vmatprep.subr.bf16.mxu1 %v4981_v50  ;;  %v5065_v50 = vld [vmem:[#allocation4 + $0x574] ss:$8 sps:$4 sm:$0xff]  }
  0xd6   :  { %3352 = vmatpush1.bf16.msra.mxu0 %v4976_v51  ;;  %v5060_v51 = vld [vmem:[#allocation4 + $0x470] ss:$8 sps:$4 sm:$0xff]  }
  0xd7   :  { %3393 = vmatpush1.bf16.msra.mxu1 %v4979_v52  ;;  %3353 = vmatprep.subr.bf16.mxu0 %v4984_v53  ;;  %v5063_v52 = vld [vmem:[#allocation4 + $0x570] ss:$8 sps:$4 sm:$0xff]   ;;  %v5068_v53 = vld [vmem:[#allocation4 + $0x484] ss:$8 sps:$4 sm:$0xff]  }
  0xd8   :  { %3394 = vmatprep.subr.bf16.mxu1 %v4987_v54  ;;  %v5071_v54 = vld [vmem:[#allocation4 + $0x584] ss:$8 sps:$4 sm:$0xff]  }
  0xda   :  { %3354 = vmatpush1.bf16.msra.mxu0 %v4982_v55  ;;  %v5066_v55 = vld [vmem:[#allocation4 + $0x480] ss:$8 sps:$4 sm:$0xff]  }
  0xdb   :  { %3395 = vmatpush1.bf16.msra.mxu1 %v4985_v56  ;;  %3355 = vmatprep.subr.bf16.mxu0 %v4990_v57  ;;  %v5069_v56 = vld [vmem:[#allocation4 + $0x580] ss:$8 sps:$4 sm:$0xff]   ;;  %v5074_v57 = vld [vmem:[#allocation4 + $0x494] ss:$8 sps:$4 sm:$0xff]  }
  0xdc   :  { %3396 = vmatprep.subr.bf16.mxu1 %v4993_v58  ;;  %v5077_v58 = vld [vmem:[#allocation4 + $0x594] ss:$8 sps:$4 sm:$0xff]  }
  0xde   :  { %3356 = vmatpush1.bf16.msra.mxu0 %v4988_v59  ;;  %v5072_v59 = vld [vmem:[#allocation4 + $0x490] ss:$8 sps:$4 sm:$0xff]  }
  0xdf   :  { %3397 = vmatpush1.bf16.msra.mxu1 %v4991_v60  ;;  %3357 = vmatprep.subr.bf16.mxu0 %v4996_v61  ;;  %v5075_v60 = vld [vmem:[#allocation4 + $0x590] ss:$8 sps:$4 sm:$0xff]   ;;  %v5080_v61 = vld [vmem:[#allocation4 + $0x4a4] ss:$8 sps:$4 sm:$0xff]  }
  0xe0   :  { %3398 = vmatprep.subr.bf16.mxu1 %v4999_v62  ;;  %v5083_v62 = vld [vmem:[#allocation4 + $0x5a4] ss:$8 sps:$4 sm:$0xff]  }
  0xe2   :  { %3358 = vmatpush1.bf16.msra.mxu0 %v4994_v63  ;;  %v5078_v63 = vld [vmem:[#allocation4 + $0x4a0] ss:$8 sps:$4 sm:$0xff]  }
  0xe3   :  { %3399 = vmatpush1.bf16.msra.mxu1 %v4997_v0  ;;  %3359 = vmatprep.subr.bf16.mxu0 %v5002_v1  ;;  %v5081_v0 = vld [vmem:[#allocation4 + $0x5a0] ss:$8 sps:$4 sm:$0xff]   ;;  %v5086_v1 = vld [vmem:[#allocation4 + $0x4b4] ss:$8 sps:$4 sm:$0xff]  }
  0xe4   :  { %3400 = vmatprep.subr.bf16.mxu1 %v5005_v2  ;;  %v5089_v2 = vld [vmem:[#allocation4 + $0x5b4] ss:$8 sps:$4 sm:$0xff]  }
  0xe6   :  { %3360 = vmatpush1.bf16.msra.mxu0 %v5000_v3  ;;  %v5084_v3 = vld [vmem:[#allocation4 + $0x4b0] ss:$8 sps:$4 sm:$0xff]  }
  0xe7   :  { %3401 = vmatpush1.bf16.msra.mxu1 %v5003_v4  ;;  %3361 = vmatprep.subr.bf16.mxu0 %v5008_v5  ;;  %v5087_v4 = vld [vmem:[#allocation4 + $0x5b0] ss:$8 sps:$4 sm:$0xff]   ;;  %v5092_v5 = vld [vmem:[#allocation4 + $0x4c4] ss:$8 sps:$4 sm:$0xff]  }
  0xe8   :  { %3402 = vmatprep.subr.bf16.mxu1 %v5011_v6  ;;  %v5095_v6 = vld [vmem:[#allocation4 + $0x5c4] ss:$8 sps:$4 sm:$0xff]  }
  0xea   :  { %3362 = vmatpush1.bf16.msra.mxu0 %v5006_v7  ;;  %v5090_v7 = vld [vmem:[#allocation4 + $0x4c0] ss:$8 sps:$4 sm:$0xff]  }
  0xeb   :  { %3403 = vmatpush1.bf16.msra.mxu1 %v5009_v8  ;;  %3363 = vmatprep.subr.bf16.mxu0 %v5014_v9  ;;  %v5093_v8 = vld [vmem:[#allocation4 + $0x5c0] ss:$8 sps:$4 sm:$0xff]   ;;  %v5098_v9 = vld [vmem:[#allocation4 + $0x4d4] ss:$8 sps:$4 sm:$0xff]  }
  0xec   :  { %3404 = vmatprep.subr.bf16.mxu1 %v5017_v10  ;;  %v5101_v10 = vld [vmem:[#allocation4 + $0x5d4] ss:$8 sps:$4 sm:$0xff]  }
  0xee   :  { %3364 = vmatpush1.bf16.msra.mxu0 %v5012_v11  ;;  %v5096_v11 = vld [vmem:[#allocation4 + $0x4d0] ss:$8 sps:$4 sm:$0xff]  }
  0xef   :  { %3405 = vmatpush1.bf16.msra.mxu1 %v5015_v12  ;;  %3415 = vmatprep.subr.bf16.mxu0 %v5020_v15  ;;  %v5099_v12 = vld [vmem:[#allocation4 + $0x5d0] ss:$8 sps:$4 sm:$0xff]   ;;  %v5102_v15 = vld [vmem:[#allocation4 + $0x4e0] ss:$8 sps:$4 sm:$0xff]  }
  0xf0   :  { %3456 = vmatprep.subr.bf16.mxu1 %v5023_v16  ;;  %v5105_v16 = vld [vmem:[#allocation4 + $0x5e0] ss:$8 sps:$4 sm:$0xff]  }
  0xf1   :  { %3366 = vmatmul.mubr.bf16.vlgmr.msra.gmra.mrb[4].mxu0 %v151_v17  ;;  %v5110_v17 = vld [vmem:[#allocation4 + $0x4f4] ss:$8 sps:$4 sm:$0xff]  }
  0xf2   :  { %3407 = vmatmul.mubr.bf16.vlgmr.msra.gmra.mrb[4].mxu1 %v153_v18  ;;  %3416 = vmatpush1.bf16.msra.mxu0 %v5018_v19  ;;  %v5113_v18 = vld [vmem:[#allocation4 + $0x5f4] ss:$8 sps:$4 sm:$0xff]   ;;  %v5108_v19 = vld [vmem:[#allocation4 + $0x4f0] ss:$8 sps:$4 sm:$0xff]  }
  0xf3   :  { %3457 = vmatpush1.bf16.msra.mxu1 %v5021_v20  ;;  %3417 = vmatprep.subr.bf16.mxu0 %v5026_v21  ;;  %v5111_v20 = vld [vmem:[#allocation4 + $0x5f0] ss:$8 sps:$4 sm:$0xff]   ;;  %v123_v21 = vld [vmem:[%s6008_s0 + $0x40] sm:$0xff] }
  0xf4   :  { %3458 = vmatprep.subr.bf16.mxu1 %v5029_v22  ;;  %3447 = vmatprep.mubr.bf16.mxu0 %v156_v26  ;;  %v125_v22 = vld [vmem:[%s6008_s0 + $0x50] sm:$0xff]  ;;  %v5117_v26 = vld [vmem:[#allocation4 + $0x700] ss:$8 sps:$4 sm:$0xff]   ;;  %v155_v27 = vpack.c.bf16 %v123_v21, %v123_v21 }
  0xf5   :  { %3488 = vmatprep.mubr.bf16.mxu1 %v158_v29  ;;  %v128_v29 = vld [vmem:[%s6008_s0 + $0x68] sm:$0xff] }
  0xf6   :  { %3418 = vmatpush1.bf16.msra.mxu0 %v5024_v24  ;;  %v5119_v24 = vld [vmem:[#allocation4 + $0x704] ss:$8 sps:$4 sm:$0xff]  }
  0xf7   :  { %3459 = vmatpush1.bf16.msra.mxu1 %v5027_v25  ;;  %3419 = vmatprep.subr.bf16.mxu0 %v5032_v28  ;;  %v5114_v25 = vld [vmem:[#allocation4 + $0x600] ss:$8 sps:$4 sm:$0xff]   ;;  %v157_v28 = vpack.c.bf16 %v125_v22, %v125_v22  ;;  %v5200_v21 = vld [vmem:[#allocation4 + $0x6e4] ss:$8 sps:$4 sm:$0xff]  }
  0xf8   :  { %3460 = vmatprep.subr.bf16.mxu1 %v5035_v30  ;;  %v130_v30 = vld [vmem:[%s6008_s0 + $0x78] sm:$0xff]  ;;  %v5203_v22 = vld [vmem:[#allocation4 + $0x7e4] ss:$8 sps:$4 sm:$0xff]  }
  0xfa   :  { %3420 = vmatpush1.bf16.msra.mxu0 %v5030_v31  ;;  %v5122_v31 = vld [vmem:[#allocation4 + $0x614] ss:$8 sps:$4 sm:$0xff]  }
  0xfb   :  { %3461 = vmatpush1.bf16.msra.mxu1 %v5033_v32  ;;  %3421 = vmatprep.subr.bf16.mxu0 %v5038_v33  ;;  %v5125_v32 = vld [vmem:[#allocation4 + $0x714] ss:$8 sps:$4 sm:$0xff]   ;;  %v160_v33 = vpack.c.bf16 %v128_v29, %v128_v29 }
  0xfc   :  { %3462 = vmatprep.subr.bf16.mxu1 %v5041_v34  ;;  %v162_v34 = vpack.c.bf16 %v130_v30, %v130_v30  ;;  %v127_v29 = vld [vmem:[%s6008_s0 + $0x60] sm:$0xff]  ;;  %v129_v30 = vld [vmem:[%s6008_s0 + $0x70] sm:$0xff] }
  0xfe   :  { %3422 = vmatpush1.bf16.msra.mxu0 %v5036_v35  ;;  %v5120_v35 = vld [vmem:[#allocation4 + $0x610] ss:$8 sps:$4 sm:$0xff]  }
  0xff   :  { %3463 = vmatpush1.bf16.msra.mxu1 %v5039_v36  ;;  %3423 = vmatprep.subr.bf16.mxu0 %v5044_v37  ;;  %v5123_v36 = vld [vmem:[#allocation4 + $0x710] ss:$8 sps:$4 sm:$0xff]   ;;  %v5128_v37 = vld [vmem:[#allocation4 + $0x624] ss:$8 sps:$4 sm:$0xff]  }
 0x100   :  { %3464 = vmatprep.subr.bf16.mxu1 %v5047_v38  ;;  %v5131_v38 = vld [vmem:[#allocation4 + $0x724] ss:$8 sps:$4 sm:$0xff]  }
 0x102   :  { %3424 = vmatpush1.bf16.msra.mxu0 %v5042_v39  ;;  %v5126_v39 = vld [vmem:[#allocation4 + $0x620] ss:$8 sps:$4 sm:$0xff]  }
 0x103   :  { %3465 = vmatpush1.bf16.msra.mxu1 %v5045_v40  ;;  %3425 = vmatprep.subr.bf16.mxu0 %v5050_v41  ;;  %v5129_v40 = vld [vmem:[#allocation4 + $0x720] ss:$8 sps:$4 sm:$0xff]   ;;  %v5134_v41 = vld [vmem:[#allocation4 + $0x634] ss:$8 sps:$4 sm:$0xff]  }
 0x104   :  { %3466 = vmatprep.subr.bf16.mxu1 %v5053_v42  ;;  %v5137_v42 = vld [vmem:[#allocation4 + $0x734] ss:$8 sps:$4 sm:$0xff]  }
 0x106   :  { %3426 = vmatpush1.bf16.msra.mxu0 %v5048_v43  ;;  %v5132_v43 = vld [vmem:[#allocation4 + $0x630] ss:$8 sps:$4 sm:$0xff]  }
 0x107   :  { %3467 = vmatpush1.bf16.msra.mxu1 %v5051_v44  ;;  %3427 = vmatprep.subr.bf16.mxu0 %v5056_v45  ;;  %v5135_v44 = vld [vmem:[#allocation4 + $0x730] ss:$8 sps:$4 sm:$0xff]   ;;  %v5140_v45 = vld [vmem:[#allocation4 + $0x644] ss:$8 sps:$4 sm:$0xff]  }
 0x108   :  { %3468 = vmatprep.subr.bf16.mxu1 %v5059_v46  ;;  %v5143_v46 = vld [vmem:[#allocation4 + $0x744] ss:$8 sps:$4 sm:$0xff]  }
 0x10a   :  { %3428 = vmatpush1.bf16.msra.mxu0 %v5054_v47  ;;  %v5138_v47 = vld [vmem:[#allocation4 + $0x640] ss:$8 sps:$4 sm:$0xff]  }
 0x10b   :  { %3469 = vmatpush1.bf16.msra.mxu1 %v5057_v48  ;;  %3429 = vmatprep.subr.bf16.mxu0 %v5062_v49  ;;  %v5141_v48 = vld [vmem:[#allocation4 + $0x740] ss:$8 sps:$4 sm:$0xff]   ;;  %v5146_v49 = vld [vmem:[#allocation4 + $0x654] ss:$8 sps:$4 sm:$0xff]  }
 0x10c   :  { %3470 = vmatprep.subr.bf16.mxu1 %v5065_v50  ;;  %v5149_v50 = vld [vmem:[#allocation4 + $0x754] ss:$8 sps:$4 sm:$0xff]  }
 0x10e   :  { %3430 = vmatpush1.bf16.msra.mxu0 %v5060_v51  ;;  %v5144_v51 = vld [vmem:[#allocation4 + $0x650] ss:$8 sps:$4 sm:$0xff]  }
 0x10f   :  { %3471 = vmatpush1.bf16.msra.mxu1 %v5063_v52  ;;  %3431 = vmatprep.subr.bf16.mxu0 %v5068_v53  ;;  %v5147_v52 = vld [vmem:[#allocation4 + $0x750] ss:$8 sps:$4 sm:$0xff]   ;;  %v5152_v53 = vld [vmem:[#allocation4 + $0x664] ss:$8 sps:$4 sm:$0xff]  }
 0x110   :  { %3472 = vmatprep.subr.bf16.mxu1 %v5071_v54  ;;  %v5155_v54 = vld [vmem:[#allocation4 + $0x764] ss:$8 sps:$4 sm:$0xff]  }
 0x112   :  { %3432 = vmatpush1.bf16.msra.mxu0 %v5066_v55  ;;  %v5150_v55 = vld [vmem:[#allocation4 + $0x660] ss:$8 sps:$4 sm:$0xff]  }
 0x113   :  { %3473 = vmatpush1.bf16.msra.mxu1 %v5069_v56  ;;  %3433 = vmatprep.subr.bf16.mxu0 %v5074_v57  ;;  %v5153_v56 = vld [vmem:[#allocation4 + $0x760] ss:$8 sps:$4 sm:$0xff]   ;;  %v5158_v57 = vld [vmem:[#allocation4 + $0x674] ss:$8 sps:$4 sm:$0xff]  }
 0x114   :  { %3474 = vmatprep.subr.bf16.mxu1 %v5077_v58  ;;  %v5161_v58 = vld [vmem:[#allocation4 + $0x774] ss:$8 sps:$4 sm:$0xff]  }
 0x116   :  { %3434 = vmatpush1.bf16.msra.mxu0 %v5072_v59  ;;  %v5156_v59 = vld [vmem:[#allocation4 + $0x670] ss:$8 sps:$4 sm:$0xff]  }
 0x117   :  { %3475 = vmatpush1.bf16.msra.mxu1 %v5075_v60  ;;  %3435 = vmatprep.subr.bf16.mxu0 %v5080_v61  ;;  %v5159_v60 = vld [vmem:[#allocation4 + $0x770] ss:$8 sps:$4 sm:$0xff]   ;;  %v5164_v61 = vld [vmem:[#allocation4 + $0x684] ss:$8 sps:$4 sm:$0xff]  }
 0x118   :  { %3476 = vmatprep.subr.bf16.mxu1 %v5083_v62  ;;  %v5167_v62 = vld [vmem:[#allocation4 + $0x784] ss:$8 sps:$4 sm:$0xff]  }
 0x11a   :  { %3436 = vmatpush1.bf16.msra.mxu0 %v5078_v63  ;;  %v5162_v63 = vld [vmem:[#allocation4 + $0x680] ss:$8 sps:$4 sm:$0xff]  }
 0x11b   :  { %3477 = vmatpush1.bf16.msra.mxu1 %v5081_v0  ;;  %3437 = vmatprep.subr.bf16.mxu0 %v5086_v1  ;;  %v5165_v0 = vld [vmem:[#allocation4 + $0x780] ss:$8 sps:$4 sm:$0xff]   ;;  %v5170_v1 = vld [vmem:[#allocation4 + $0x694] ss:$8 sps:$4 sm:$0xff]  }
 0x11c   :  { %3478 = vmatprep.subr.bf16.mxu1 %v5089_v2  ;;  %v5173_v2 = vld [vmem:[#allocation4 + $0x794] ss:$8 sps:$4 sm:$0xff]  }
 0x11e   :  { %3438 = vmatpush1.bf16.msra.mxu0 %v5084_v3  ;;  %v5168_v3 = vld [vmem:[#allocation4 + $0x690] ss:$8 sps:$4 sm:$0xff]  }
 0x11f   :  { %3479 = vmatpush1.bf16.msra.mxu1 %v5087_v4  ;;  %3439 = vmatprep.subr.bf16.mxu0 %v5092_v5  ;;  %v5171_v4 = vld [vmem:[#allocation4 + $0x790] ss:$8 sps:$4 sm:$0xff]   ;;  %v5176_v5 = vld [vmem:[#allocation4 + $0x6a4] ss:$8 sps:$4 sm:$0xff]  }
 0x120   :  { %3480 = vmatprep.subr.bf16.mxu1 %v5095_v6  ;;  %v5179_v6 = vld [vmem:[#allocation4 + $0x7a4] ss:$8 sps:$4 sm:$0xff]  }
 0x122   :  { %3440 = vmatpush1.bf16.msra.mxu0 %v5090_v7  ;;  %v5174_v7 = vld [vmem:[#allocation4 + $0x6a0] ss:$8 sps:$4 sm:$0xff]  }
 0x123   :  { %3481 = vmatpush1.bf16.msra.mxu1 %v5093_v8  ;;  %3441 = vmatprep.subr.bf16.mxu0 %v5098_v9  ;;  %v5177_v8 = vld [vmem:[#allocation4 + $0x7a0] ss:$8 sps:$4 sm:$0xff]   ;;  %v5182_v9 = vld [vmem:[#allocation4 + $0x6b4] ss:$8 sps:$4 sm:$0xff]  }
 0x124   :  { %3482 = vmatprep.subr.bf16.mxu1 %v5101_v10  ;;  %v5185_v10 = vld [vmem:[#allocation4 + $0x7b4] ss:$8 sps:$4 sm:$0xff]  }
 0x126   :  { %3442 = vmatpush1.bf16.msra.mxu0 %v5096_v11  ;;  %v5180_v11 = vld [vmem:[#allocation4 + $0x6b0] ss:$8 sps:$4 sm:$0xff]  }
 0x127   :  { %3483 = vmatpush1.bf16.msra.mxu1 %v5099_v12  ;;  %3443 = vmatprep.subr.bf16.mxu0 %v5104_v13  ;;  %v5183_v12 = vld [vmem:[#allocation4 + $0x7b0] ss:$8 sps:$4 sm:$0xff]   ;;  %v5188_v13 = vld [vmem:[#allocation4 + $0x6c4] ss:$8 sps:$4 sm:$0xff]  }
 0x128   :  { %3484 = vmatprep.subr.bf16.mxu1 %v5107_v14  ;;  %v5191_v14 = vld [vmem:[#allocation4 + $0x7c4] ss:$8 sps:$4 sm:$0xff]  }
 0x12a   :  { %3444 = vmatpush1.bf16.msra.mxu0 %v5102_v15  ;;  %v5186_v15 = vld [vmem:[#allocation4 + $0x6c0] ss:$8 sps:$4 sm:$0xff]  }
 0x12b   :  { %3485 = vmatpush1.bf16.msra.mxu1 %v5105_v16  ;;  %3445 = vmatprep.subr.bf16.mxu0 %v5110_v17  ;;  %v5189_v16 = vld [vmem:[#allocation4 + $0x7c0] ss:$8 sps:$4 sm:$0xff]   ;;  %v5194_v17 = vld [vmem:[#allocation4 + $0x6d4] ss:$8 sps:$4 sm:$0xff]  }
 0x12c   :  { %3486 = vmatprep.subr.bf16.mxu1 %v5113_v18  ;;  %v5197_v18 = vld [vmem:[#allocation4 + $0x7d4] ss:$8 sps:$4 sm:$0xff]  }
 0x12e   :  { %3446 = vmatpush1.bf16.msra.mxu0 %v5108_v19  ;;  %v5192_v19 = vld [vmem:[#allocation4 + $0x6d0] ss:$8 sps:$4 sm:$0xff]  }
 0x12f   :  { %3487 = vmatpush1.bf16.msra.mxu1 %v5111_v20  ;;  %3497 = vmatprep.subr.bf16.mxu0 %v5116_v23  ;;  %v5195_v20 = vld [vmem:[#allocation4 + $0x7d0] ss:$8 sps:$4 sm:$0xff]   ;;  %v5198_v23 = vld [vmem:[#allocation4 + $0x6e0] ss:$8 sps:$4 sm:$0xff]  }
 0x130   :  { %3538 = vmatprep.subr.bf16.mxu1 %v5119_v24  ;;  %v5201_v24 = vld [vmem:[#allocation4 + $0x7e0] ss:$8 sps:$4 sm:$0xff]  }
 0x131   :  { %3448 = vmatmul.mubr.bf16.vlgmr.msra.gmra.mrb[8].mxu0 %v155_v27  ;;  %v5204_v27 = vld [vmem:[#allocation4 + $0x6f0] ss:$8 sps:$4 sm:$0xff]  }
 0x132   :  { %3489 = vmatmul.mubr.bf16.vlgmr.msra.gmra.mrb[8].mxu1 %v157_v28  ;;  %3498 = vmatpush1.bf16.msra.mxu0 %v5114_v25  ;;  %v5206_v25 = vld [vmem:[#allocation4 + $0x6f4] ss:$8 sps:$4 sm:$0xff]   ;;  %v5207_v28 = vld [vmem:[#allocation4 + $0x7f0] ss:$8 sps:$4 sm:$0xff]  }
 0x133   :  { %3539 = vmatpush1.bf16.msra.mxu1 %v5117_v26  ;;  %3499 = vmatprep.subr.bf16.mxu0 %v5122_v31  ;;  %v5209_v26 = vld [vmem:[#allocation4 + $0x7f4] ss:$8 sps:$4 sm:$0xff]   ;;  %v5212_v31 = vld [vmem:[#allocation4 + $0x804] ss:$8 sps:$4 sm:$0xff]  }
 0x134   :  { %3540 = vmatprep.subr.bf16.mxu1 %v5125_v32  ;;  %3529 = vmatprep.mubr.bf16.mxu0 %v160_v33  ;;  %v5215_v32 = vld [vmem:[#allocation4 + $0x904] ss:$8 sps:$4 sm:$0xff]   ;;  %v5210_v33 = vld [vmem:[#allocation4 + $0x800] ss:$8 sps:$4 sm:$0xff]  }
 0x135   :  { %3570 = vmatprep.mubr.bf16.mxu1 %v162_v34  ;;  %v5213_v34 = vld [vmem:[#allocation4 + $0x900] ss:$8 sps:$4 sm:$0xff]  }
 0x136   :  { %3500 = vmatpush1.bf16.msra.mxu0 %v5120_v35  ;;  %v159_v35 = vpack.c.bf16 %v127_v29, %v127_v29  ;;  %v5276_v29 = vld [vmem:[#allocation4 + $0x8b0] ss:$8 sps:$4 sm:$0xff]  }
 0x137   :  { %3541 = vmatpush1.bf16.msra.mxu1 %v5123_v36  ;;  %3501 = vmatprep.subr.bf16.mxu0 %v5128_v37  ;;  %v161_v36 = vpack.c.bf16 %v129_v30, %v129_v30  ;;  %v132_v37 = vld [vmem:[%s6008_s0 + $0x88] sm:$0xff]  ;;  %v5279_v30 = vld [vmem:[#allocation4 + $0x9b0] ss:$8 sps:$4 sm:$0xff]  }
 0x138   :  { %3542 = vmatprep.subr.bf16.mxu1 %v5131_v38  ;;  %v134_v38 = vld [vmem:[%s6008_s0 + $0x98] sm:$0xff] }
 0x13a   :  { %3502 = vmatpush1.bf16.msra.mxu0 %v5126_v39  ;;  %v5218_v39 = vld [vmem:[#allocation4 + $0x814] ss:$8 sps:$4 sm:$0xff]  }
 0x13b   :  { %3543 = vmatpush1.bf16.msra.mxu1 %v5129_v40  ;;  %3503 = vmatprep.subr.bf16.mxu0 %v5134_v41  ;;  %v5221_v40 = vld [vmem:[#allocation4 + $0x914] ss:$8 sps:$4 sm:$0xff]   ;;  %v164_v41 = vpack.c.bf16 %v132_v37, %v132_v37  ;;  %v5288_v37 = vld [vmem:[#allocation4 + $0x8d0] ss:$8 sps:$4 sm:$0xff]  }
 0x13c   :  { %3544 = vmatprep.subr.bf16.mxu1 %v5137_v42  ;;  %v166_v42 = vpack.c.bf16 %v134_v38, %v134_v38  ;;  %v5291_v38 = vld [vmem:[#allocation4 + $0x9d0] ss:$8 sps:$4 sm:$0xff]  }
 0x13e   :  { %3504 = vmatpush1.bf16.msra.mxu0 %v5132_v43  ;;  %v5216_v43 = vld [vmem:[#allocation4 + $0x810] ss:$8 sps:$4 sm:$0xff]  }
 0x13f   :  { %3545 = vmatpush1.bf16.msra.mxu1 %v5135_v44  ;;  %3505 = vmatprep.subr.bf16.mxu0 %v5140_v45  ;;  %v5219_v44 = vld [vmem:[#allocation4 + $0x910] ss:$8 sps:$4 sm:$0xff]   ;;  %v5224_v45 = vld [vmem:[#allocation4 + $0x824] ss:$8 sps:$4 sm:$0xff]  }
 0x140   :  { %3546 = vmatprep.subr.bf16.mxu1 %v5143_v46  ;;  %v5227_v46 = vld [vmem:[#allocation4 + $0x924] ss:$8 sps:$4 sm:$0xff]  }
 0x142   :  { %3506 = vmatpush1.bf16.msra.mxu0 %v5138_v47  ;;  %v5222_v47 = vld [vmem:[#allocation4 + $0x820] ss:$8 sps:$4 sm:$0xff]  }
 0x143   :  { %3547 = vmatpush1.bf16.msra.mxu1 %v5141_v48  ;;  %3507 = vmatprep.subr.bf16.mxu0 %v5146_v49  ;;  %v5225_v48 = vld [vmem:[#allocation4 + $0x920] ss:$8 sps:$4 sm:$0xff]   ;;  %v5230_v49 = vld [vmem:[#allocation4 + $0x834] ss:$8 sps:$4 sm:$0xff]  }
 0x144   :  { %3548 = vmatprep.subr.bf16.mxu1 %v5149_v50  ;;  %v5233_v50 = vld [vmem:[#allocation4 + $0x934] ss:$8 sps:$4 sm:$0xff]  }
 0x146   :  { %3508 = vmatpush1.bf16.msra.mxu0 %v5144_v51  ;;  %v5228_v51 = vld [vmem:[#allocation4 + $0x830] ss:$8 sps:$4 sm:$0xff]  }
 0x147   :  { %3549 = vmatpush1.bf16.msra.mxu1 %v5147_v52  ;;  %3509 = vmatprep.subr.bf16.mxu0 %v5152_v53  ;;  %v5231_v52 = vld [vmem:[#allocation4 + $0x930] ss:$8 sps:$4 sm:$0xff]   ;;  %v5236_v53 = vld [vmem:[#allocation4 + $0x844] ss:$8 sps:$4 sm:$0xff]  }
 0x148   :  { %3550 = vmatprep.subr.bf16.mxu1 %v5155_v54  ;;  %v5239_v54 = vld [vmem:[#allocation4 + $0x944] ss:$8 sps:$4 sm:$0xff]  }
 0x14a   :  { %3510 = vmatpush1.bf16.msra.mxu0 %v5150_v55  ;;  %v5234_v55 = vld [vmem:[#allocation4 + $0x840] ss:$8 sps:$4 sm:$0xff]  }
 0x14b   :  { %3551 = vmatpush1.bf16.msra.mxu1 %v5153_v56  ;;  %3511 = vmatprep.subr.bf16.mxu0 %v5158_v57  ;;  %v5237_v56 = vld [vmem:[#allocation4 + $0x940] ss:$8 sps:$4 sm:$0xff]   ;;  %v5242_v57 = vld [vmem:[#allocation4 + $0x854] ss:$8 sps:$4 sm:$0xff]  }
 0x14c   :  { %3552 = vmatprep.subr.bf16.mxu1 %v5161_v58  ;;  %v5245_v58 = vld [vmem:[#allocation4 + $0x954] ss:$8 sps:$4 sm:$0xff]  }
 0x14e   :  { %3512 = vmatpush1.bf16.msra.mxu0 %v5156_v59  ;;  %v5240_v59 = vld [vmem:[#allocation4 + $0x850] ss:$8 sps:$4 sm:$0xff]  }
 0x14f   :  { %3553 = vmatpush1.bf16.msra.mxu1 %v5159_v60  ;;  %3513 = vmatprep.subr.bf16.mxu0 %v5164_v61  ;;  %v5243_v60 = vld [vmem:[#allocation4 + $0x950] ss:$8 sps:$4 sm:$0xff]   ;;  %v5248_v61 = vld [vmem:[#allocation4 + $0x864] ss:$8 sps:$4 sm:$0xff]  }
 0x150   :  { %3554 = vmatprep.subr.bf16.mxu1 %v5167_v62  ;;  %v5251_v62 = vld [vmem:[#allocation4 + $0x964] ss:$8 sps:$4 sm:$0xff]  }
 0x152   :  { %3514 = vmatpush1.bf16.msra.mxu0 %v5162_v63 }
 0x153   :  { %3555 = vmatpush1.bf16.msra.mxu1 %v5165_v0  ;;  %3515 = vmatprep.subr.bf16.mxu0 %v5170_v1  ;;  %v5246_v1 = vld [vmem:[#allocation4 + $0x860] ss:$8 sps:$4 sm:$0xff]  }
 0x154   :  { %3556 = vmatprep.subr.bf16.mxu1 %v5173_v2 }
 0x156   :  { %3516 = vmatpush1.bf16.msra.mxu0 %v5168_v3 }
 0x157   :  { %3557 = vmatpush1.bf16.msra.mxu1 %v5171_v4  ;;  %3517 = vmatprep.subr.bf16.mxu0 %v5176_v5  ;;  %v5249_v5 = vld [vmem:[#allocation4 + $0x960] ss:$8 sps:$4 sm:$0xff]  }
 0x158   :  { %3558 = vmatprep.subr.bf16.mxu1 %v5179_v6 }
 0x15a   :  { %3518 = vmatpush1.bf16.msra.mxu0 %v5174_v7 }
 0x15b   :  { %3559 = vmatpush1.bf16.msra.mxu1 %v5177_v8  ;;  %3519 = vmatprep.subr.bf16.mxu0 %v5182_v9  ;;  %v5254_v9 = vld [vmem:[#allocation4 + $0x874] ss:$8 sps:$4 sm:$0xff]  }
 0x15c   :  { %3560 = vmatprep.subr.bf16.mxu1 %v5185_v10 }
 0x15e   :  { %3520 = vmatpush1.bf16.msra.mxu0 %v5180_v11 }
 0x15f   :  { %3561 = vmatpush1.bf16.msra.mxu1 %v5183_v12  ;;  %3521 = vmatprep.subr.bf16.mxu0 %v5188_v13  ;;  %v5257_v12 = vld [vmem:[#allocation4 + $0x974] ss:$8 sps:$4 sm:$0xff]   ;;  %v5252_v13 = vld [vmem:[#allocation4 + $0x870] ss:$8 sps:$4 sm:$0xff]  }
 0x160   :  { %3562 = vmatprep.subr.bf16.mxu1 %v5191_v14  ;;  %v5255_v14 = vld [vmem:[#allocation4 + $0x970] ss:$8 sps:$4 sm:$0xff]  }
 0x162   :  { %3522 = vmatpush1.bf16.msra.mxu0 %v5186_v15  ;;  %v5260_v15 = vld [vmem:[#allocation4 + $0x884] ss:$8 sps:$4 sm:$0xff]  }
 0x163   :  { %3563 = vmatpush1.bf16.msra.mxu1 %v5189_v16  ;;  %3523 = vmatprep.subr.bf16.mxu0 %v5194_v17  ;;  %v5263_v16 = vld [vmem:[#allocation4 + $0x984] ss:$8 sps:$4 sm:$0xff]   ;;  %v5258_v17 = vld [vmem:[#allocation4 + $0x880] ss:$8 sps:$4 sm:$0xff]  }
 0x164   :  { %3564 = vmatprep.subr.bf16.mxu1 %v5197_v18  ;;  %v5261_v18 = vld [vmem:[#allocation4 + $0x980] ss:$8 sps:$4 sm:$0xff]  }
 0x166   :  { %3524 = vmatpush1.bf16.msra.mxu0 %v5192_v19  ;;  %v5266_v19 = vld [vmem:[#allocation4 + $0x894] ss:$8 sps:$4 sm:$0xff]  }
 0x167   :  { %3565 = vmatpush1.bf16.msra.mxu1 %v5195_v20  ;;  %3525 = vmatprep.subr.bf16.mxu0 %v5200_v21  ;;  %v5269_v20 = vld [vmem:[#allocation4 + $0x994] ss:$8 sps:$4 sm:$0xff]   ;;  %v5264_v21 = vld [vmem:[#allocation4 + $0x890] ss:$8 sps:$4 sm:$0xff]  }
 0x168   :  { %3566 = vmatprep.subr.bf16.mxu1 %v5203_v22  ;;  %v5267_v22 = vld [vmem:[#allocation4 + $0x990] ss:$8 sps:$4 sm:$0xff]  }
 0x16a   :  { %3526 = vmatpush1.bf16.msra.mxu0 %v5198_v23  ;;  %v5272_v23 = vld [vmem:[#allocation4 + $0x8a4] ss:$8 sps:$4 sm:$0xff]  }
 0x16b   :  { %3567 = vmatpush1.bf16.msra.mxu1 %v5201_v24  ;;  %3527 = vmatprep.subr.bf16.mxu0 %v5206_v25  ;;  %v5275_v24 = vld [vmem:[#allocation4 + $0x9a4] ss:$8 sps:$4 sm:$0xff]   ;;  %v5270_v25 = vld [vmem:[#allocation4 + $0x8a0] ss:$8 sps:$4 sm:$0xff]  }
 0x16c   :  { %3568 = vmatprep.subr.bf16.mxu1 %v5209_v26  ;;  %v5273_v26 = vld [vmem:[#allocation4 + $0x9a0] ss:$8 sps:$4 sm:$0xff]  }
 0x16e   :  { %3528 = vmatpush1.bf16.msra.mxu0 %v5204_v27  ;;  %v5278_v27 = vld [vmem:[#allocation4 + $0x8b4] ss:$8 sps:$4 sm:$0xff]  }
 0x16f   :  { %3569 = vmatpush1.bf16.msra.mxu1 %v5207_v28  ;;  %3579 = vmatprep.subr.bf16.mxu0 %v5212_v31  ;;  %v5281_v28 = vld [vmem:[#allocation4 + $0x9b4] ss:$8 sps:$4 sm:$0xff]   ;;  %v5284_v31 = vld [vmem:[#allocation4 + $0x8c4] ss:$8 sps:$4 sm:$0xff]  }
 0x170   :  { %3620 = vmatprep.subr.bf16.mxu1 %v5215_v32  ;;  %v5287_v32 = vld [vmem:[#allocation4 + $0x9c4] ss:$8 sps:$4 sm:$0xff]  }
 0x171   :  { %3530 = vmatmul.mubr.bf16.vlgmr.msra.gmra.mrb[12].mxu0 %v159_v35  ;;  %v5290_v35 = vld [vmem:[#allocation4 + $0x8d4] ss:$8 sps:$4 sm:$0xff]  }
 0x172   :  { %3571 = vmatmul.mubr.bf16.vlgmr.msra.gmra.mrb[12].mxu1 %v161_v36  ;;  %3580 = vmatpush1.bf16.msra.mxu0 %v5210_v33  ;;  %v5282_v33 = vld [vmem:[#allocation4 + $0x8c0] ss:$8 sps:$4 sm:$0xff]   ;;  %v5293_v36 = vld [vmem:[#allocation4 + $0x9d4] ss:$8 sps:$4 sm:$0xff]  }
 0x173   :  { %3621 = vmatpush1.bf16.msra.mxu1 %v5213_v34  ;;  %3581 = vmatprep.subr.bf16.mxu0 %v5218_v39  ;;  %v5285_v34 = vld [vmem:[#allocation4 + $0x9c0] ss:$8 sps:$4 sm:$0xff]   ;;  %v5296_v39 = vld [vmem:[#allocation4 + $0x8e4] ss:$8 sps:$4 sm:$0xff]  }
 0x174   :  { %3622 = vmatprep.subr.bf16.mxu1 %v5221_v40  ;;  %3611 = vmatprep.mubr.bf16.mxu0 %v164_v41  ;;  %v5299_v40 = vld [vmem:[#allocation4 + $0x9e4] ss:$8 sps:$4 sm:$0xff]   ;;  %v5294_v41 = vld [vmem:[#allocation4 + $0x8e0] ss:$8 sps:$4 sm:$0xff]  }
 0x175   :  { %3652 = vmatprep.mubr.bf16.mxu1 %v166_v42  ;;  %v5297_v42 = vld [vmem:[#allocation4 + $0x9e0] ss:$8 sps:$4 sm:$0xff]  }
 0x176   :  { %3582 = vmatpush1.bf16.msra.mxu0 %v5216_v43  ;;  %v5302_v43 = vld [vmem:[#allocation4 + $0x8f4] ss:$8 sps:$4 sm:$0xff]  }
 0x177   :  { %3623 = vmatpush1.bf16.msra.mxu1 %v5219_v44  ;;  %3583 = vmatprep.subr.bf16.mxu0 %v5224_v45  ;;  %v5305_v44 = vld [vmem:[#allocation4 + $0x9f4] ss:$8 sps:$4 sm:$0xff]   ;;  %v5300_v45 = vld [vmem:[#allocation4 + $0x8f0] ss:$8 sps:$4 sm:$0xff]  }
 0x178   :  { %3624 = vmatprep.subr.bf16.mxu1 %v5227_v46  ;;  %v5303_v46 = vld [vmem:[#allocation4 + $0x9f0] ss:$8 sps:$4 sm:$0xff]  }
 0x17a   :  { %3584 = vmatpush1.bf16.msra.mxu0 %v5222_v47  ;;  %v131_v47 = vld [vmem:[%s6008_s0 + $0x80] sm:$0xff] }
 0x17b   :  { %3625 = vmatpush1.bf16.msra.mxu1 %v5225_v48  ;;  %3585 = vmatprep.subr.bf16.mxu0 %v5230_v49  ;;  %v133_v48 = vld [vmem:[%s6008_s0 + $0x90] sm:$0xff] }
 0x17c   :  { %3626 = vmatprep.subr.bf16.mxu1 %v5233_v50  ;;  %v5308_v49 = vld [vmem:[#allocation4 + $0xa04] ss:$8 sps:$4 sm:$0xff]  }
 0x17d   :  { %v5311_v50 = vld [vmem:[#allocation4 + $0xb04] ss:$8 sps:$4 sm:$0xff]  }
 0x17e   :  { %3586 = vmatpush1.bf16.msra.mxu0 %v5228_v51  ;;  %v163_v51 = vpack.c.bf16 %v131_v47, %v131_v47  ;;  %v5374_v47 = vld [vmem:[#allocation4 + $0xab4] ss:$8 sps:$4 sm:$0xff]  }
 0x17f   :  { %3627 = vmatpush1.bf16.msra.mxu1 %v5231_v52  ;;  %3587 = vmatprep.subr.bf16.mxu0 %v5236_v53  ;;  %v165_v52 = vpack.c.bf16 %v133_v48, %v133_v48  ;;  %v136_v53 = vld [vmem:[%s6008_s0 + $0xa8] sm:$0xff]  ;;  %v5377_v48 = vld [vmem:[#allocation4 + $0xbb4] ss:$8 sps:$4 sm:$0xff]  }
 0x180   :  { %3628 = vmatprep.subr.bf16.mxu1 %v5239_v54  ;;  %v138_v54 = vld [vmem:[%s6008_s0 + $0xb8] sm:$0xff] }
 0x182   :  { %3588 = vmatpush1.bf16.msra.mxu0 %v5234_v55  ;;  %v5306_v55 = vld [vmem:[#allocation4 + $0xa00] ss:$8 sps:$4 sm:$0xff]  }
 0x183   :  { %3629 = vmatpush1.bf16.msra.mxu1 %v5237_v56  ;;  %3589 = vmatprep.subr.bf16.mxu0 %v5242_v57  ;;  %v5309_v56 = vld [vmem:[#allocation4 + $0xb00] ss:$8 sps:$4 sm:$0xff]   ;;  %v5314_v57 = vld [vmem:[#allocation4 + $0xa14] ss:$8 sps:$4 sm:$0xff]  }
 0x184   :  { %3630 = vmatprep.subr.bf16.mxu1 %v5245_v58  ;;  %v3285_v63 = vpop.f32.mrb[0].mxu0  ;;  %v5317_v58 = vld [vmem:[#allocation4 + $0xb14] ss:$8 sps:$4 sm:$0xff]  }
 0x185   :  { %v3326_v0 = vpop.f32.mrb[0].mxu1  ;;  %v3287_v3 = vpop.f32.mrb[1].mxu0 }
 0x186   :  { %v5931_v2 = vadd.f32 %v3326_v0, %v3285_v63  ;;  %v3328_v4 = vpop.f32.mrb[1].mxu1  ;;  %v3289_v7 = vpop.f32.mrb[2].mxu0  ;;  %3590 = vmatpush1.bf16.msra.mxu0 %v5240_v59  ;;  %v168_v59 = vpack.c.bf16 %v136_v53, %v136_v53  ;;  %v5320_v63 = vld [vmem:[#allocation4 + $0xa24] ss:$8 sps:$4 sm:$0xff]   ;;  %v5378_v53 = vld [vmem:[#allocation4 + $0xac0] ss:$8 sps:$4 sm:$0xff]  }
 0x187   :  { %v5933_v6 = vadd.f32 %v3328_v4, %v3287_v3  ;;  %v3330_v8 = vpop.f32.mrb[2].mxu1  ;;  %3631 = vmatpush1.bf16.msra.mxu1 %v5243_v60  ;;  %v3290_v10 = vpop.f32.mrb[3].mxu0  ;;  %3591 = vmatprep.subr.bf16.mxu0 %v5248_v61  ;;  %v170_v60 = vpack.c.bf16 %v138_v54, %v138_v54  ;;  %v5312_v61 = vld [vmem:[#allocation4 + $0xa10] ss:$8 sps:$4 sm:$0xff]   ;;  %v5323_v0 = vld [vmem:[#allocation4 + $0xb24] ss:$8 sps:$4 sm:$0xff]  }
 0x188   :  { %v3331_v11 = vpop.f32.mrb[3].mxu1  ;;  %3632 = vmatprep.subr.bf16.mxu1 %v5251_v62  ;;  %v5315_v62 = vld [vmem:[#allocation4 + $0xb10] ss:$8 sps:$4 sm:$0xff]   ;;  %v5321_v3 = vld [vmem:[#allocation4 + $0xb20] ss:$8 sps:$4 sm:$0xff]  }
 0x189   :  { %v5326_v4 = vld [vmem:[#allocation4 + $0xa34] ss:$8 sps:$4 sm:$0xff]   ;;  %v5324_v7 = vld [vmem:[#allocation4 + $0xa30] ss:$8 sps:$4 sm:$0xff]   ;;  %v5335_v10 = vld [vmem:[#allocation4 + $0xb44] ss:$8 sps:$4 sm:$0xff]  }
 0x18a   :  { %3592 = vmatpush1.bf16.msra.mxu0 %v5246_v1  ;;  %v5318_v1 = vld [vmem:[#allocation4 + $0xa20] ss:$8 sps:$4 sm:$0xff]   ;;  %v5327_v8 = vld [vmem:[#allocation4 + $0xb30] ss:$8 sps:$4 sm:$0xff]  }
 0x18b   :  { %3633 = vmatpush1.bf16.msra.mxu1 %v5249_v5  ;;  %3593 = vmatprep.subr.bf16.mxu0 %v5254_v9  ;;  %v5329_v5 = vld [vmem:[#allocation4 + $0xb34] ss:$8 sps:$4 sm:$0xff]   ;;  %v5332_v9 = vld [vmem:[#allocation4 + $0xa44] ss:$8 sps:$4 sm:$0xff]   ;;  %v5330_v11 = vld [vmem:[#allocation4 + $0xa40] ss:$8 sps:$4 sm:$0xff]  }
 0x18c   :  { %3634 = vmatprep.subr.bf16.mxu1 %v5257_v12  ;;  %v5333_v12 = vld [vmem:[#allocation4 + $0xb40] ss:$8 sps:$4 sm:$0xff]  }
 0x18d   :  { %v5381_v54 = vld [vmem:[#allocation4 + $0xbc0] ss:$8 sps:$4 sm:$0xff]  }
 0x18e   :  { %3594 = vmatpush1.bf16.msra.mxu0 %v5252_v13  ;;  %v5338_v13 = vld [vmem:[#allocation4 + $0xa54] ss:$8 sps:$4 sm:$0xff]  }
 0x18f   :  { %3635 = vmatpush1.bf16.msra.mxu1 %v5255_v14  ;;  %3595 = vmatprep.subr.bf16.mxu0 %v5260_v15  ;;  %v5341_v14 = vld [vmem:[#allocation4 + $0xb54] ss:$8 sps:$4 sm:$0xff]   ;;  %v5336_v15 = vld [vmem:[#allocation4 + $0xa50] ss:$8 sps:$4 sm:$0xff]  }
 0x190   :  { %3636 = vmatprep.subr.bf16.mxu1 %v5263_v16  ;;  %v5339_v16 = vld [vmem:[#allocation4 + $0xb50] ss:$8 sps:$4 sm:$0xff]  }
 0x192   :  { %3596 = vmatpush1.bf16.msra.mxu0 %v5258_v17  ;;  %v5344_v17 = vld [vmem:[#allocation4 + $0xa64] ss:$8 sps:$4 sm:$0xff]  }
 0x193   :  { %3637 = vmatpush1.bf16.msra.mxu1 %v5261_v18  ;;  %3597 = vmatprep.subr.bf16.mxu0 %v5266_v19  ;;  %v5347_v18 = vld [vmem:[#allocation4 + $0xb64] ss:$8 sps:$4 sm:$0xff]  }
 0x194   :  { %3638 = vmatprep.subr.bf16.mxu1 %v5269_v20 }
 0x196   :  { %3598 = vmatpush1.bf16.msra.mxu0 %v5264_v21 }
 0x197   :  { %3639 = vmatpush1.bf16.msra.mxu1 %v5267_v22  ;;  %3599 = vmatprep.subr.bf16.mxu0 %v5272_v23 }
 0x198   :  { %3640 = vmatprep.subr.bf16.mxu1 %v5275_v24 }
 0x19a   :  { %3600 = vmatpush1.bf16.msra.mxu0 %v5270_v25 }
 0x19b   :  { %3641 = vmatpush1.bf16.msra.mxu1 %v5273_v26  ;;  %3601 = vmatprep.subr.bf16.mxu0 %v5278_v27  ;;  %v5342_v27 = vld [vmem:[#allocation4 + $0xa60] ss:$8 sps:$4 sm:$0xff]  }
 0x19c   :  { %3642 = vmatprep.subr.bf16.mxu1 %v5281_v28  ;;  %v5345_v28 = vld [vmem:[#allocation4 + $0xb60] ss:$8 sps:$4 sm:$0xff]  }
 0x19e   :  { %3602 = vmatpush1.bf16.msra.mxu0 %v5276_v29 }
 0x19f   :  { %3643 = vmatpush1.bf16.msra.mxu1 %v5279_v30  ;;  %3603 = vmatprep.subr.bf16.mxu0 %v5284_v31 }
 0x1a0   :  { %3644 = vmatprep.subr.bf16.mxu1 %v5287_v32  ;;  %v5350_v32 = vld [vmem:[#allocation4 + $0xa74] ss:$8 sps:$4 sm:$0xff]  }
 0x1a2   :  { %3604 = vmatpush1.bf16.msra.mxu0 %v5282_v33  ;;  %v5353_v33 = vld [vmem:[#allocation4 + $0xb74] ss:$8 sps:$4 sm:$0xff]  }
 0x1a3   :  { %3645 = vmatpush1.bf16.msra.mxu1 %v5285_v34  ;;  %3605 = vmatprep.subr.bf16.mxu0 %v5290_v35  ;;  %v5356_v35 = vld [vmem:[#allocation4 + $0xa84] ss:$8 sps:$4 sm:$0xff]  }
 0x1a4   :  { %3646 = vmatprep.subr.bf16.mxu1 %v5293_v36  ;;  %v5359_v36 = vld [vmem:[#allocation4 + $0xb84] ss:$8 sps:$4 sm:$0xff]  }
 0x1a6   :  { %3606 = vmatpush1.bf16.msra.mxu0 %v5288_v37  ;;  %v5354_v37 = vld [vmem:[#allocation4 + $0xa80] ss:$8 sps:$4 sm:$0xff]  }
 0x1a7   :  { %3647 = vmatpush1.bf16.msra.mxu1 %v5291_v38  ;;  %3607 = vmatprep.subr.bf16.mxu0 %v5296_v39  ;;  %v5357_v38 = vld [vmem:[#allocation4 + $0xb80] ss:$8 sps:$4 sm:$0xff]   ;;  %v5362_v39 = vld [vmem:[#allocation4 + $0xa94] ss:$8 sps:$4 sm:$0xff]  }
 0x1a8   :  { %3648 = vmatprep.subr.bf16.mxu1 %v5299_v40  ;;  %v5365_v40 = vld [vmem:[#allocation4 + $0xb94] ss:$8 sps:$4 sm:$0xff]  }
 0x1aa   :  { %3608 = vmatpush1.bf16.msra.mxu0 %v5294_v41  ;;  %v5360_v41 = vld [vmem:[#allocation4 + $0xa90] ss:$8 sps:$4 sm:$0xff]  }
 0x1ab   :  { %3649 = vmatpush1.bf16.msra.mxu1 %v5297_v42  ;;  %3609 = vmatprep.subr.bf16.mxu0 %v5302_v43  ;;  %v5363_v42 = vld [vmem:[#allocation4 + $0xb90] ss:$8 sps:$4 sm:$0xff]   ;;  %v5368_v43 = vld [vmem:[#allocation4 + $0xaa4] ss:$8 sps:$4 sm:$0xff]  }
 0x1ac   :  { %3650 = vmatprep.subr.bf16.mxu1 %v5305_v44  ;;  %v5371_v44 = vld [vmem:[#allocation4 + $0xba4] ss:$8 sps:$4 sm:$0xff]  }
 0x1ae   :  { %3610 = vmatpush1.bf16.msra.mxu0 %v5300_v45  ;;  %v5366_v45 = vld [vmem:[#allocation4 + $0xaa0] ss:$8 sps:$4 sm:$0xff]  }
 0x1af   :  { %3651 = vmatpush1.bf16.msra.mxu1 %v5303_v46  ;;  %3661 = vmatprep.subr.bf16.mxu0 %v5308_v49  ;;  %v5369_v46 = vld [vmem:[#allocation4 + $0xba0] ss:$8 sps:$4 sm:$0xff]   ;;  %v5372_v49 = vld [vmem:[#allocation4 + $0xab0] ss:$8 sps:$4 sm:$0xff]  }
 0x1b0   :  { %3702 = vmatprep.subr.bf16.mxu1 %v5311_v50  ;;  %v5375_v50 = vld [vmem:[#allocation4 + $0xbb0] ss:$8 sps:$4 sm:$0xff]  }
 0x1b1   :  { %3612 = vmatmul.mubr.bf16.vlgmr.msra.gmra.mrb[16].mxu0 %v163_v51  ;;  %v5380_v51 = vld [vmem:[#allocation4 + $0xac4] ss:$8 sps:$4 sm:$0xff]  }
 0x1b2   :  { %3653 = vmatmul.mubr.bf16.vlgmr.msra.gmra.mrb[16].mxu1 %v165_v52  ;;  %3662 = vmatpush1.bf16.msra.mxu0 %v5306_v55  ;;  %v5383_v52 = vld [vmem:[#allocation4 + $0xbc4] ss:$8 sps:$4 sm:$0xff]   ;;  %v5386_v55 = vld [vmem:[#allocation4 + $0xad4] ss:$8 sps:$4 sm:$0xff]  }
 0x1b3   :  { %3703 = vmatpush1.bf16.msra.mxu1 %v5309_v56  ;;  %3663 = vmatprep.subr.bf16.mxu0 %v5314_v57  ;;  %v5389_v56 = vld [vmem:[#allocation4 + $0xbd4] ss:$8 sps:$4 sm:$0xff]   ;;  %v5384_v57 = vld [vmem:[#allocation4 + $0xad0] ss:$8 sps:$4 sm:$0xff]  }
 0x1b4   :  { %3704 = vmatprep.subr.bf16.mxu1 %v5317_v58  ;;  %3693 = vmatprep.mubr.bf16.mxu0 %v168_v59  ;;  %v5387_v58 = vld [vmem:[#allocation4 + $0xbd0] ss:$8 sps:$4 sm:$0xff]   ;;  %v5392_v59 = vld [vmem:[#allocation4 + $0xae4] ss:$8 sps:$4 sm:$0xff]  }
 0x1b5   :  { %3734 = vmatprep.mubr.bf16.mxu1 %v170_v60  ;;  %v5395_v60 = vld [vmem:[#allocation4 + $0xbe4] ss:$8 sps:$4 sm:$0xff]  }
 0x1b6   :  { %3664 = vmatpush1.bf16.msra.mxu0 %v5312_v61  ;;  %v5390_v61 = vld [vmem:[#allocation4 + $0xae0] ss:$8 sps:$4 sm:$0xff]  }
 0x1b7   :  { %3705 = vmatpush1.bf16.msra.mxu1 %v5315_v62  ;;  %3665 = vmatprep.subr.bf16.mxu0 %v5320_v63  ;;  %v5393_v62 = vld [vmem:[#allocation4 + $0xbe0] ss:$8 sps:$4 sm:$0xff]   ;;  %v5398_v63 = vld [vmem:[#allocation4 + $0xaf4] ss:$8 sps:$4 sm:$0xff]  }
 0x1b8   :  { %3706 = vmatprep.subr.bf16.mxu1 %v5323_v0  ;;  %v5401_v0 = vld [vmem:[#allocation4 + $0xbf4] ss:$8 sps:$4 sm:$0xff]  }
 0x1ba   :  { %3666 = vmatpush1.bf16.msra.mxu0 %v5318_v1  ;;  %v5396_v1 = vld [vmem:[#allocation4 + $0xaf0] ss:$8 sps:$4 sm:$0xff]  }
 0x1bb   :  { %3707 = vmatpush1.bf16.msra.mxu1 %v5321_v3  ;;  %3667 = vmatprep.subr.bf16.mxu0 %v5326_v4  ;;  %v5399_v3 = vld [vmem:[#allocation4 + $0xbf0] ss:$8 sps:$4 sm:$0xff]   ;;  %v135_v4 = vld [vmem:[%s6008_s0 + $0xa0] sm:$0xff] }
 0x1bc   :  { %3708 = vmatprep.subr.bf16.mxu1 %v5329_v5  ;;  %v137_v5 = vld [vmem:[%s6008_s0 + $0xb0] sm:$0xff] }
 0x1be   :  { %3668 = vmatpush1.bf16.msra.mxu0 %v5324_v7  ;;  %v5404_v7 = vld [vmem:[#allocation4 + $0xc04] ss:$8 sps:$4 sm:$0xff]  }
 0x1bf   :  { %3709 = vmatpush1.bf16.msra.mxu1 %v5327_v8  ;;  %3669 = vmatprep.subr.bf16.mxu0 %v5332_v9  ;;  %v5407_v8 = vld [vmem:[#allocation4 + $0xd04] ss:$8 sps:$4 sm:$0xff]   ;;  %v167_v9 = vpack.c.bf16 %v135_v4, %v135_v4  ;;  %v5470_v4 = vld [vmem:[#allocation4 + $0xcb4] ss:$8 sps:$4 sm:$0xff]  }
 0x1c0   :  { %3710 = vmatprep.subr.bf16.mxu1 %v5335_v10  ;;  %v169_v10 = vpack.c.bf16 %v137_v5, %v137_v5  ;;  %v5473_v5 = vld [vmem:[#allocation4 + $0xdb4] ss:$8 sps:$4 sm:$0xff]  }
 0x1c2   :  { %3670 = vmatpush1.bf16.msra.mxu0 %v5330_v11  ;;  %v140_v11 = vld [vmem:[%s6008_s0 + $0xc8] sm:$0xff] }
 0x1c3   :  { %3711 = vmatpush1.bf16.msra.mxu1 %v5333_v12  ;;  %3671 = vmatprep.subr.bf16.mxu0 %v5338_v13  ;;  %v142_v12 = vld [vmem:[%s6008_s0 + $0xd8] sm:$0xff]  ;;  %v5402_v13 = vld [vmem:[#allocation4 + $0xc00] ss:$8 sps:$4 sm:$0xff]  }
 0x1c4   :  { %3712 = vmatprep.subr.bf16.mxu1 %v5341_v14  ;;  %v3367_v19 = vpop.f32.mrb[4].mxu0  ;;  %v5405_v14 = vld [vmem:[#allocation4 + $0xd00] ss:$8 sps:$4 sm:$0xff]  }
 0x1c5   :  { %v3408_v20 = vpop.f32.mrb[4].mxu1  ;;  %v3368_v21 = vadd.f32 %v3367_v19, %v5931_v2  ;;  %v3369_v22 = vpop.f32.mrb[5].mxu0  ;;  %v5348_v2 = vld [vmem:[#allocation4 + $0xa70] ss:$8 sps:$4 sm:$0xff]  }
 0x1c6   :  { %v3410_v23 = vpop.f32.mrb[5].mxu1  ;;  %v3370_v24 = vadd.f32 %v3369_v22, %v5933_v6  ;;  %v3371_v25 = vpop.f32.mrb[6].mxu0  ;;  %3672 = vmatpush1.bf16.msra.mxu0 %v5336_v15  ;;  %v5351_v6 = vld [vmem:[#allocation4 + $0xb70] ss:$8 sps:$4 sm:$0xff]   ;;  %v5410_v15 = vld [vmem:[#allocation4 + $0xc14] ss:$8 sps:$4 sm:$0xff]  }
 0x1c7   :  { %v3412_v26 = vpop.f32.mrb[6].mxu1  ;;  %3713 = vmatpush1.bf16.msra.mxu1 %v5339_v16  ;;  %v5949_v29 = vadd.f32 %v3408_v20, %v3368_v21  ;;  %v3372_v30 = vpop.f32.mrb[7].mxu0  ;;  %3673 = vmatprep.subr.bf16.mxu0 %v5344_v17  ;;  %v5413_v16 = vld [vmem:[#allocation4 + $0xd14] ss:$8 sps:$4 sm:$0xff]   ;;  %v172_v17 = vpack.c.bf16 %v140_v11, %v140_v11  ;;  %v5408_v19 = vld [vmem:[#allocation4 + $0xc10] ss:$8 sps:$4 sm:$0xff]  }
 0x1c8   :  { %v3413_v31 = vpop.f32.mrb[7].mxu1  ;;  %3714 = vmatprep.subr.bf16.mxu1 %v5347_v18  ;;  %v5951_v34 = vadd.f32 %v3410_v23, %v3370_v24  ;;  %v174_v18 = vpack.c.bf16 %v142_v12, %v142_v12  ;;  %v5411_v20 = vld [vmem:[#allocation4 + $0xd10] ss:$8 sps:$4 sm:$0xff]   ;;  %v5416_v21 = vld [vmem:[#allocation4 + $0xc24] ss:$8 sps:$4 sm:$0xff]  }
 0x1c9   :  { %v5419_v22 = vld [vmem:[#allocation4 + $0xd24] ss:$8 sps:$4 sm:$0xff]   ;;  %v5414_v23 = vld [vmem:[#allocation4 + $0xc20] ss:$8 sps:$4 sm:$0xff]   ;;  %v5422_v25 = vld [vmem:[#allocation4 + $0xc34] ss:$8 sps:$4 sm:$0xff]  }
 0x1ca   :  { %3674 = vmatpush1.bf16.msra.mxu0 %v5342_v27  ;;  %v5417_v24 = vld [vmem:[#allocation4 + $0xd20] ss:$8 sps:$4 sm:$0xff]   ;;  %v5425_v26 = vld [vmem:[#allocation4 + $0xd34] ss:$8 sps:$4 sm:$0xff]   ;;  %v5420_v27 = vld [vmem:[#allocation4 + $0xc30] ss:$8 sps:$4 sm:$0xff]  }
 0x1cb   :  { %3715 = vmatpush1.bf16.msra.mxu1 %v5345_v28  ;;  %3675 = vmatprep.subr.bf16.mxu0 %v5350_v32  ;;  %v5423_v28 = vld [vmem:[#allocation4 + $0xd30] ss:$8 sps:$4 sm:$0xff]   ;;  %v5428_v30 = vld [vmem:[#allocation4 + $0xc44] ss:$8 sps:$4 sm:$0xff]   ;;  %v5426_v32 = vld [vmem:[#allocation4 + $0xc40] ss:$8 sps:$4 sm:$0xff]  }
 0x1cc   :  { %3716 = vmatprep.subr.bf16.mxu1 %v5353_v33  ;;  %v5431_v31 = vld [vmem:[#allocation4 + $0xd44] ss:$8 sps:$4 sm:$0xff]   ;;  %v5429_v33 = vld [vmem:[#allocation4 + $0xd40] ss:$8 sps:$4 sm:$0xff]  }
 0x1cd   :  { %v5474_v11 = vld [vmem:[#allocation4 + $0xcc0] ss:$8 sps:$4 sm:$0xff]  }
 0x1ce   :  { %3676 = vmatpush1.bf16.msra.mxu0 %v5348_v2  ;;  %v5434_v2 = vld [vmem:[#allocation4 + $0xc54] ss:$8 sps:$4 sm:$0xff]   ;;  %v5477_v12 = vld [vmem:[#allocation4 + $0xdc0] ss:$8 sps:$4 sm:$0xff]  }
 0x1cf   :  { %3717 = vmatpush1.bf16.msra.mxu1 %v5351_v6  ;;  %3677 = vmatprep.subr.bf16.mxu0 %v5356_v35  ;;  %v5437_v6 = vld [vmem:[#allocation4 + $0xd54] ss:$8 sps:$4 sm:$0xff]   ;;  %v5432_v35 = vld [vmem:[#allocation4 + $0xc50] ss:$8 sps:$4 sm:$0xff]  }
 0x1d0   :  { %3718 = vmatprep.subr.bf16.mxu1 %v5359_v36  ;;  %v5435_v36 = vld [vmem:[#allocation4 + $0xd50] ss:$8 sps:$4 sm:$0xff]  }
 0x1d2   :  { %3678 = vmatpush1.bf16.msra.mxu0 %v5354_v37  ;;  %v5440_v37 = vld [vmem:[#allocation4 + $0xc64] ss:$8 sps:$4 sm:$0xff]  }
 0x1d3   :  { %3719 = vmatpush1.bf16.msra.mxu1 %v5357_v38  ;;  %3679 = vmatprep.subr.bf16.mxu0 %v5362_v39  ;;  %v5443_v38 = vld [vmem:[#allocation4 + $0xd64] ss:$8 sps:$4 sm:$0xff]  }
 0x1d4   :  { %3720 = vmatprep.subr.bf16.mxu1 %v5365_v40 }
 0x1d6   :  { %3680 = vmatpush1.bf16.msra.mxu0 %v5360_v41 }
 0x1d7   :  { %3721 = vmatpush1.bf16.msra.mxu1 %v5363_v42  ;;  %3681 = vmatprep.subr.bf16.mxu0 %v5368_v43 }
 0x1d8   :  { %3722 = vmatprep.subr.bf16.mxu1 %v5371_v44 }
 0x1da   :  { %3682 = vmatpush1.bf16.msra.mxu0 %v5366_v45 }
 0x1db   :  { %3723 = vmatpush1.bf16.msra.mxu1 %v5369_v46  ;;  %3683 = vmatprep.subr.bf16.mxu0 %v5374_v47  ;;  %v5438_v47 = vld [vmem:[#allocation4 + $0xc60] ss:$8 sps:$4 sm:$0xff]  }
 0x1dc   :  { %3724 = vmatprep.subr.bf16.mxu1 %v5377_v48  ;;  %v5441_v48 = vld [vmem:[#allocation4 + $0xd60] ss:$8 sps:$4 sm:$0xff]  }
 0x1de   :  { %3684 = vmatpush1.bf16.msra.mxu0 %v5372_v49 }
 0x1df   :  { %3725 = vmatpush1.bf16.msra.mxu1 %v5375_v50  ;;  %3685 = vmatprep.subr.bf16.mxu0 %v5380_v51 }
 0x1e0   :  { %3726 = vmatprep.subr.bf16.mxu1 %v5383_v52  ;;  %v5446_v52 = vld [vmem:[#allocation4 + $0xc74] ss:$8 sps:$4 sm:$0xff]  }
 0x1e2   :  { %3686 = vmatpush1.bf16.msra.mxu0 %v5378_v53  ;;  %v5449_v53 = vld [vmem:[#allocation4 + $0xd74] ss:$8 sps:$4 sm:$0xff]  }
 0x1e3   :  { %3727 = vmatpush1.bf16.msra.mxu1 %v5381_v54  ;;  %3687 = vmatprep.subr.bf16.mxu0 %v5386_v55  ;;  %v5452_v55 = vld [vmem:[#allocation4 + $0xc84] ss:$8 sps:$4 sm:$0xff]  }
 0x1e4   :  { %3728 = vmatprep.subr.bf16.mxu1 %v5389_v56  ;;  %v5455_v56 = vld [vmem:[#allocation4 + $0xd84] ss:$8 sps:$4 sm:$0xff]  }
 0x1e6   :  { %3688 = vmatpush1.bf16.msra.mxu0 %v5384_v57  ;;  %v5450_v57 = vld [vmem:[#allocation4 + $0xc80] ss:$8 sps:$4 sm:$0xff]  }
 0x1e7   :  { %3729 = vmatpush1.bf16.msra.mxu1 %v5387_v58  ;;  %3689 = vmatprep.subr.bf16.mxu0 %v5392_v59  ;;  %v5453_v58 = vld [vmem:[#allocation4 + $0xd80] ss:$8 sps:$4 sm:$0xff]   ;;  %v5458_v59 = vld [vmem:[#allocation4 + $0xc94] ss:$8 sps:$4 sm:$0xff]  }
 0x1e8   :  { %3730 = vmatprep.subr.bf16.mxu1 %v5395_v60  ;;  %v5461_v60 = vld [vmem:[#allocation4 + $0xd94] ss:$8 sps:$4 sm:$0xff]  }
 0x1ea   :  { %3690 = vmatpush1.bf16.msra.mxu0 %v5390_v61  ;;  %v5456_v61 = vld [vmem:[#allocation4 + $0xc90] ss:$8 sps:$4 sm:$0xff]  }
 0x1eb   :  { %3731 = vmatpush1.bf16.msra.mxu1 %v5393_v62  ;;  %3691 = vmatprep.subr.bf16.mxu0 %v5398_v63  ;;  %v5459_v62 = vld [vmem:[#allocation4 + $0xd90] ss:$8 sps:$4 sm:$0xff]   ;;  %v5464_v63 = vld [vmem:[#allocation4 + $0xca4] ss:$8 sps:$4 sm:$0xff]  }
 0x1ec   :  { %3732 = vmatprep.subr.bf16.mxu1 %v5401_v0  ;;  %v5467_v0 = vld [vmem:[#allocation4 + $0xda4] ss:$8 sps:$4 sm:$0xff]  }
 0x1ee   :  { %3692 = vmatpush1.bf16.msra.mxu0 %v5396_v1  ;;  %v5462_v1 = vld [vmem:[#allocation4 + $0xca0] ss:$8 sps:$4 sm:$0xff]  }
 0x1ef   :  { %3733 = vmatpush1.bf16.msra.mxu1 %v5399_v3  ;;  %3743 = vmatprep.subr.bf16.mxu0 %v5404_v7  ;;  %v5465_v3 = vld [vmem:[#allocation4 + $0xda0] ss:$8 sps:$4 sm:$0xff]   ;;  %v5468_v7 = vld [vmem:[#allocation4 + $0xcb0] ss:$8 sps:$4 sm:$0xff]  }
 0x1f0   :  { %3784 = vmatprep.subr.bf16.mxu1 %v5407_v8  ;;  %v5471_v8 = vld [vmem:[#allocation4 + $0xdb0] ss:$8 sps:$4 sm:$0xff]  }
 0x1f1   :  { %3694 = vmatmul.mubr.bf16.vlgmr.msra.gmra.mrb[20].mxu0 %v167_v9  ;;  %v5476_v9 = vld [vmem:[#allocation4 + $0xcc4] ss:$8 sps:$4 sm:$0xff]  }
 0x1f2   :  { %3735 = vmatmul.mubr.bf16.vlgmr.msra.gmra.mrb[20].mxu1 %v169_v10  ;;  %3744 = vmatpush1.bf16.msra.mxu0 %v5402_v13  ;;  %v5479_v10 = vld [vmem:[#allocation4 + $0xdc4] ss:$8 sps:$4 sm:$0xff]   ;;  %v5482_v13 = vld [vmem:[#allocation4 + $0xcd4] ss:$8 sps:$4 sm:$0xff]  }
 0x1f3   :  { %3785 = vmatpush1.bf16.msra.mxu1 %v5405_v14  ;;  %3745 = vmatprep.subr.bf16.mxu0 %v5410_v15  ;;  %v5485_v14 = vld [vmem:[#allocation4 + $0xdd4] ss:$8 sps:$4 sm:$0xff]   ;;  %v5480_v15 = vld [vmem:[#allocation4 + $0xcd0] ss:$8 sps:$4 sm:$0xff]  }
 0x1f4   :  { %3786 = vmatprep.subr.bf16.mxu1 %v5413_v16  ;;  %3775 = vmatprep.mubr.bf16.mxu0 %v172_v17  ;;  %v5483_v16 = vld [vmem:[#allocation4 + $0xdd0] ss:$8 sps:$4 sm:$0xff]   ;;  %v5488_v17 = vld [vmem:[#allocation4 + $0xce4] ss:$8 sps:$4 sm:$0xff]  }
 0x1f5   :  { %3816 = vmatprep.mubr.bf16.mxu1 %v174_v18  ;;  %v5491_v18 = vld [vmem:[#allocation4 + $0xde4] ss:$8 sps:$4 sm:$0xff]  }
 0x1f6   :  { %3746 = vmatpush1.bf16.msra.mxu0 %v5408_v19  ;;  %v5486_v19 = vld [vmem:[#allocation4 + $0xce0] ss:$8 sps:$4 sm:$0xff]  }
 0x1f7   :  { %3787 = vmatpush1.bf16.msra.mxu1 %v5411_v20  ;;  %3747 = vmatprep.subr.bf16.mxu0 %v5416_v21  ;;  %v5489_v20 = vld [vmem:[#allocation4 + $0xde0] ss:$8 sps:$4 sm:$0xff]   ;;  %v5494_v21 = vld [vmem:[#allocation4 + $0xcf4] ss:$8 sps:$4 sm:$0xff]  }
 0x1f8   :  { %3788 = vmatprep.subr.bf16.mxu1 %v5419_v22  ;;  %v5497_v22 = vld [vmem:[#allocation4 + $0xdf4] ss:$8 sps:$4 sm:$0xff]  }
 0x1fa   :  { %3748 = vmatpush1.bf16.msra.mxu0 %v5414_v23  ;;  %v5492_v23 = vld [vmem:[#allocation4 + $0xcf0] ss:$8 sps:$4 sm:$0xff]  }
 0x1fb   :  { %3789 = vmatpush1.bf16.msra.mxu1 %v5417_v24  ;;  %3749 = vmatprep.subr.bf16.mxu0 %v5422_v25  ;;  %v5495_v24 = vld [vmem:[#allocation4 + $0xdf0] ss:$8 sps:$4 sm:$0xff]   ;;  %v139_v25 = vld [vmem:[%s6008_s0 + $0xc0] sm:$0xff] }
 0x1fc   :  { %3790 = vmatprep.subr.bf16.mxu1 %v5425_v26  ;;  %v141_v26 = vld [vmem:[%s6008_s0 + $0xd0] sm:$0xff] }
 0x1fe   :  { %3750 = vmatpush1.bf16.msra.mxu0 %v5420_v27  ;;  %v5500_v27 = vld [vmem:[#allocation4 + $0xe04] ss:$8 sps:$4 sm:$0xff]  }
 0x1ff   :  { %3791 = vmatpush1.bf16.msra.mxu1 %v5423_v28  ;;  %3751 = vmatprep.subr.bf16.mxu0 %v5428_v30  ;;  %v5503_v28 = vld [vmem:[#allocation4 + $0xf04] ss:$8 sps:$4 sm:$0xff]   ;;  %v171_v30 = vpack.c.bf16 %v139_v25, %v139_v25  ;;  %v5566_v25 = vld [vmem:[#allocation4 + $0xeb4] ss:$8 sps:$4 sm:$0xff]  }
 0x200   :  { %3792 = vmatprep.subr.bf16.mxu1 %v5431_v31  ;;  %v173_v31 = vpack.c.bf16 %v141_v26, %v141_v26  ;;  %v5569_v26 = vld [vmem:[#allocation4 + $0xfb4] ss:$8 sps:$4 sm:$0xff]  }
 0x202   :  { %3752 = vmatpush1.bf16.msra.mxu0 %v5426_v32  ;;  %v144_v32 = vld [vmem:[%s6008_s0 + $0xe8] sm:$0xff] }
 0x203   :  { %3793 = vmatpush1.bf16.msra.mxu1 %v5429_v33  ;;  %3753 = vmatprep.subr.bf16.mxu0 %v5434_v2  ;;  %v146_v33 = vld [vmem:[%s6008_s0 + $0xf8] sm:$0xff]  ;;  %v5498_v2 = vld [vmem:[#allocation4 + $0xe00] ss:$8 sps:$4 sm:$0xff]  }
 0x204   :  { %3794 = vmatprep.subr.bf16.mxu1 %v5437_v6  ;;  %v3449_v39 = vpop.f32.mrb[8].mxu0  ;;  %v5501_v6 = vld [vmem:[#allocation4 + $0xf00] ss:$8 sps:$4 sm:$0xff]  }
 0x205   :  { %v3490_v40 = vpop.f32.mrb[8].mxu1  ;;  %v3450_v41 = vadd.f32 %v3449_v39, %v5949_v29  ;;  %v3451_v42 = vpop.f32.mrb[9].mxu0  ;;  %v5444_v29 = vld [vmem:[#allocation4 + $0xc70] ss:$8 sps:$4 sm:$0xff]  }
 0x206   :  { %v3492_v43 = vpop.f32.mrb[9].mxu1  ;;  %v3452_v44 = vadd.f32 %v3451_v42, %v5951_v34  ;;  %v3453_v45 = vpop.f32.mrb[10].mxu0  ;;  %3754 = vmatpush1.bf16.msra.mxu0 %v5432_v35  ;;  %v5447_v34 = vld [vmem:[#allocation4 + $0xd70] ss:$8 sps:$4 sm:$0xff]   ;;  %v5506_v35 = vld [vmem:[#allocation4 + $0xe14] ss:$8 sps:$4 sm:$0xff]  }
 0x207   :  { %v3494_v46 = vpop.f32.mrb[10].mxu1  ;;  %3795 = vmatpush1.bf16.msra.mxu1 %v5435_v36  ;;  %v5967_v49 = vadd.f32 %v3490_v40, %v3450_v41  ;;  %v3454_v50 = vpop.f32.mrb[11].mxu0  ;;  %3755 = vmatprep.subr.bf16.mxu0 %v5440_v37  ;;  %v5509_v36 = vld [vmem:[#allocation4 + $0xf14] ss:$8 sps:$4 sm:$0xff]   ;;  %v176_v37 = vpack.c.bf16 %v144_v32, %v144_v32  ;;  %v5504_v39 = vld [vmem:[#allocation4 + $0xe10] ss:$8 sps:$4 sm:$0xff]  }
 0x208   :  { %v3495_v51 = vpop.f32.mrb[11].mxu1  ;;  %3796 = vmatprep.subr.bf16.mxu1 %v5443_v38  ;;  %v5969_v54 = vadd.f32 %v3492_v43, %v3452_v44  ;;  %v178_v38 = vpack.c.bf16 %v146_v33, %v146_v33  ;;  %v5507_v40 = vld [vmem:[#allocation4 + $0xf10] ss:$8 sps:$4 sm:$0xff]   ;;  %v5512_v41 = vld [vmem:[#allocation4 + $0xe24] ss:$8 sps:$4 sm:$0xff]  }
 0x209   :  { %v5515_v42 = vld [vmem:[#allocation4 + $0xf24] ss:$8 sps:$4 sm:$0xff]   ;;  %v5510_v43 = vld [vmem:[#allocation4 + $0xe20] ss:$8 sps:$4 sm:$0xff]   ;;  %v5518_v45 = vld [vmem:[#allocation4 + $0xe34] ss:$8 sps:$4 sm:$0xff]  }
 0x20a   :  { %3756 = vmatpush1.bf16.msra.mxu0 %v5438_v47  ;;  %v5513_v44 = vld [vmem:[#allocation4 + $0xf20] ss:$8 sps:$4 sm:$0xff]   ;;  %v5521_v46 = vld [vmem:[#allocation4 + $0xf34] ss:$8 sps:$4 sm:$0xff]   ;;  %v5516_v47 = vld [vmem:[#allocation4 + $0xe30] ss:$8 sps:$4 sm:$0xff]  }
 0x20b   :  { %3797 = vmatpush1.bf16.msra.mxu1 %v5441_v48  ;;  %3757 = vmatprep.subr.bf16.mxu0 %v5446_v52  ;;  %v5519_v48 = vld [vmem:[#allocation4 + $0xf30] ss:$8 sps:$4 sm:$0xff]   ;;  %v5524_v50 = vld [vmem:[#allocation4 + $0xe44] ss:$8 sps:$4 sm:$0xff]   ;;  %v5522_v52 = vld [vmem:[#allocation4 + $0xe40] ss:$8 sps:$4 sm:$0xff]  }
 0x20c   :  { %3798 = vmatprep.subr.bf16.mxu1 %v5449_v53  ;;  %v5527_v51 = vld [vmem:[#allocation4 + $0xf44] ss:$8 sps:$4 sm:$0xff]   ;;  %v5525_v53 = vld [vmem:[#allocation4 + $0xf40] ss:$8 sps:$4 sm:$0xff]  }
 0x20d   :  { %v5570_v32 = vld [vmem:[#allocation4 + $0xec0] ss:$8 sps:$4 sm:$0xff]  }
 0x20e   :  { %3758 = vmatpush1.bf16.msra.mxu0 %v5444_v29  ;;  %v5530_v29 = vld [vmem:[#allocation4 + $0xe54] ss:$8 sps:$4 sm:$0xff]   ;;  %v5573_v33 = vld [vmem:[#allocation4 + $0xfc0] ss:$8 sps:$4 sm:$0xff]  }
 0x20f   :  { %3799 = vmatpush1.bf16.msra.mxu1 %v5447_v34  ;;  %3759 = vmatprep.subr.bf16.mxu0 %v5452_v55  ;;  %v5533_v34 = vld [vmem:[#allocation4 + $0xf54] ss:$8 sps:$4 sm:$0xff]   ;;  %v5528_v55 = vld [vmem:[#allocation4 + $0xe50] ss:$8 sps:$4 sm:$0xff]  }
 0x210   :  { %3800 = vmatprep.subr.bf16.mxu1 %v5455_v56  ;;  %v5531_v56 = vld [vmem:[#allocation4 + $0xf50] ss:$8 sps:$4 sm:$0xff]  }
 0x212   :  { %3760 = vmatpush1.bf16.msra.mxu0 %v5450_v57  ;;  %v5536_v57 = vld [vmem:[#allocation4 + $0xe64] ss:$8 sps:$4 sm:$0xff]  }
 0x213   :  { %3801 = vmatpush1.bf16.msra.mxu1 %v5453_v58  ;;  %3761 = vmatprep.subr.bf16.mxu0 %v5458_v59  ;;  %v5539_v58 = vld [vmem:[#allocation4 + $0xf64] ss:$8 sps:$4 sm:$0xff]  }
 0x214   :  { %3802 = vmatprep.subr.bf16.mxu1 %v5461_v60 }
 0x216   :  { %3762 = vmatpush1.bf16.msra.mxu0 %v5456_v61 }
 0x217   :  { %3803 = vmatpush1.bf16.msra.mxu1 %v5459_v62  ;;  %3763 = vmatprep.subr.bf16.mxu0 %v5464_v63 }
 0x218   :  { %3804 = vmatprep.subr.bf16.mxu1 %v5467_v0 }
 0x21a   :  { %3764 = vmatpush1.bf16.msra.mxu0 %v5462_v1 }
 0x21b   :  { %3805 = vmatpush1.bf16.msra.mxu1 %v5465_v3  ;;  %3765 = vmatprep.subr.bf16.mxu0 %v5470_v4  ;;  %v5534_v4 = vld [vmem:[#allocation4 + $0xe60] ss:$8 sps:$4 sm:$0xff]  }
 0x21c   :  { %3806 = vmatprep.subr.bf16.mxu1 %v5473_v5  ;;  %v5537_v5 = vld [vmem:[#allocation4 + $0xf60] ss:$8 sps:$4 sm:$0xff]  }
 0x21e   :  { %3766 = vmatpush1.bf16.msra.mxu0 %v5468_v7 }
 0x21f   :  { %3807 = vmatpush1.bf16.msra.mxu1 %v5471_v8  ;;  %3767 = vmatprep.subr.bf16.mxu0 %v5476_v9 }
 0x220   :  { %3808 = vmatprep.subr.bf16.mxu1 %v5479_v10  ;;  %v5542_v10 = vld [vmem:[#allocation4 + $0xe74] ss:$8 sps:$4 sm:$0xff]  }
 0x222   :  { %3768 = vmatpush1.bf16.msra.mxu0 %v5474_v11  ;;  %v5545_v11 = vld [vmem:[#allocation4 + $0xf74] ss:$8 sps:$4 sm:$0xff]  }
 0x223   :  { %3809 = vmatpush1.bf16.msra.mxu1 %v5477_v12  ;;  %3769 = vmatprep.subr.bf16.mxu0 %v5482_v13  ;;  %v5548_v13 = vld [vmem:[#allocation4 + $0xe84] ss:$8 sps:$4 sm:$0xff]  }
 0x224   :  { %3810 = vmatprep.subr.bf16.mxu1 %v5485_v14  ;;  %v5551_v14 = vld [vmem:[#allocation4 + $0xf84] ss:$8 sps:$4 sm:$0xff]  }
 0x226   :  { %3770 = vmatpush1.bf16.msra.mxu0 %v5480_v15  ;;  %v5546_v15 = vld [vmem:[#allocation4 + $0xe80] ss:$8 sps:$4 sm:$0xff]  }
 0x227   :  { %3811 = vmatpush1.bf16.msra.mxu1 %v5483_v16  ;;  %3771 = vmatprep.subr.bf16.mxu0 %v5488_v17  ;;  %v5549_v16 = vld [vmem:[#allocation4 + $0xf80] ss:$8 sps:$4 sm:$0xff]   ;;  %v5554_v17 = vld [vmem:[#allocation4 + $0xe94] ss:$8 sps:$4 sm:$0xff]  }
 0x228   :  { %3812 = vmatprep.subr.bf16.mxu1 %v5491_v18  ;;  %v5557_v18 = vld [vmem:[#allocation4 + $0xf94] ss:$8 sps:$4 sm:$0xff]  }
 0x22a   :  { %3772 = vmatpush1.bf16.msra.mxu0 %v5486_v19  ;;  %v5552_v19 = vld [vmem:[#allocation4 + $0xe90] ss:$8 sps:$4 sm:$0xff]  }
 0x22b   :  { %3813 = vmatpush1.bf16.msra.mxu1 %v5489_v20  ;;  %3773 = vmatprep.subr.bf16.mxu0 %v5494_v21  ;;  %v5555_v20 = vld [vmem:[#allocation4 + $0xf90] ss:$8 sps:$4 sm:$0xff]   ;;  %v5560_v21 = vld [vmem:[#allocation4 + $0xea4] ss:$8 sps:$4 sm:$0xff]  }
 0x22c   :  { %3814 = vmatprep.subr.bf16.mxu1 %v5497_v22  ;;  %v5563_v22 = vld [vmem:[#allocation4 + $0xfa4] ss:$8 sps:$4 sm:$0xff]  }
 0x22e   :  { %3774 = vmatpush1.bf16.msra.mxu0 %v5492_v23  ;;  %v5558_v23 = vld [vmem:[#allocation4 + $0xea0] ss:$8 sps:$4 sm:$0xff]  }
 0x22f   :  { %3815 = vmatpush1.bf16.msra.mxu1 %v5495_v24  ;;  %3825 = vmatprep.subr.bf16.mxu0 %v5500_v27  ;;  %v5561_v24 = vld [vmem:[#allocation4 + $0xfa0] ss:$8 sps:$4 sm:$0xff]   ;;  %v5564_v27 = vld [vmem:[#allocation4 + $0xeb0] ss:$8 sps:$4 sm:$0xff]  }
 0x230   :  { %3866 = vmatprep.subr.bf16.mxu1 %v5503_v28  ;;  %v5567_v28 = vld [vmem:[#allocation4 + $0xfb0] ss:$8 sps:$4 sm:$0xff]  }
 0x231   :  { %3776 = vmatmul.mubr.bf16.vlgmr.msra.gmra.mrb[24].mxu0 %v171_v30  ;;  %v5572_v30 = vld [vmem:[#allocation4 + $0xec4] ss:$8 sps:$4 sm:$0xff]  }
 0x232   :  { %3817 = vmatmul.mubr.bf16.vlgmr.msra.gmra.mrb[24].mxu1 %v173_v31  ;;  %3826 = vmatpush1.bf16.msra.mxu0 %v5498_v2  ;;  %v5575_v31 = vld [vmem:[#allocation4 + $0xfc4] ss:$8 sps:$4 sm:$0xff]   ;;  %v5578_v2 = vld [vmem:[#allocation4 + $0xed4] ss:$8 sps:$4 sm:$0xff]  }
 0x233   :  { %3867 = vmatpush1.bf16.msra.mxu1 %v5501_v6  ;;  %3827 = vmatprep.subr.bf16.mxu0 %v5506_v35  ;;  %v5581_v6 = vld [vmem:[#allocation4 + $0xfd4] ss:$8 sps:$4 sm:$0xff]   ;;  %v5576_v35 = vld [vmem:[#allocation4 + $0xed0] ss:$8 sps:$4 sm:$0xff]  }
 0x234   :  { %3868 = vmatprep.subr.bf16.mxu1 %v5509_v36  ;;  %3857 = vmatprep.mubr.bf16.mxu0 %v176_v37  ;;  %v5579_v36 = vld [vmem:[#allocation4 + $0xfd0] ss:$8 sps:$4 sm:$0xff]   ;;  %v5584_v37 = vld [vmem:[#allocation4 + $0xee4] ss:$8 sps:$4 sm:$0xff]  }
 0x235   :  { %3898 = vmatprep.mubr.bf16.mxu1 %v178_v38  ;;  %v5587_v38 = vld [vmem:[#allocation4 + $0xfe4] ss:$8 sps:$4 sm:$0xff]  }
 0x236   :  { %3828 = vmatpush1.bf16.msra.mxu0 %v5504_v39  ;;  %v5582_v39 = vld [vmem:[#allocation4 + $0xee0] ss:$8 sps:$4 sm:$0xff]  }
 0x237   :  { %3869 = vmatpush1.bf16.msra.mxu1 %v5507_v40  ;;  %3829 = vmatprep.subr.bf16.mxu0 %v5512_v41  ;;  %v5585_v40 = vld [vmem:[#allocation4 + $0xfe0] ss:$8 sps:$4 sm:$0xff]   ;;  %v5590_v41 = vld [vmem:[#allocation4 + $0xef4] ss:$8 sps:$4 sm:$0xff]  }
 0x238   :  { %3870 = vmatprep.subr.bf16.mxu1 %v5515_v42  ;;  %v5593_v42 = vld [vmem:[#allocation4 + $0xff4] ss:$8 sps:$4 sm:$0xff]  }
 0x23a   :  { %3830 = vmatpush1.bf16.msra.mxu0 %v5510_v43  ;;  %v5588_v43 = vld [vmem:[#allocation4 + $0xef0] ss:$8 sps:$4 sm:$0xff]  }
 0x23b   :  { %3871 = vmatpush1.bf16.msra.mxu1 %v5513_v44  ;;  %3831 = vmatprep.subr.bf16.mxu0 %v5518_v45  ;;  %v5591_v44 = vld [vmem:[#allocation4 + $0xff0] ss:$8 sps:$4 sm:$0xff]   ;;  %v143_v45 = vld [vmem:[%s6008_s0 + $0xe0] sm:$0xff] }
 0x23c   :  { %3872 = vmatprep.subr.bf16.mxu1 %v5521_v46  ;;  %v145_v46 = vld [vmem:[%s6008_s0 + $0xf0] sm:$0xff] }
 0x23e   :  { %3832 = vmatpush1.bf16.msra.mxu0 %v5516_v47  ;;  %v175_v47 = vpack.c.bf16 %v143_v45, %v143_v45 }
 0x23f   :  { %3873 = vmatpush1.bf16.msra.mxu1 %v5519_v48  ;;  %3833 = vmatprep.subr.bf16.mxu0 %v5524_v50  ;;  %v177_v48 = vpack.c.bf16 %v145_v46, %v145_v46 }
 0x240   :  { %3874 = vmatprep.subr.bf16.mxu1 %v5527_v51 }
 0x242   :  { %3834 = vmatpush1.bf16.msra.mxu0 %v5522_v52 }
 0x243   :  { %3875 = vmatpush1.bf16.msra.mxu1 %v5525_v53  ;;  %3835 = vmatprep.subr.bf16.mxu0 %v5530_v29 }
 0x244   :  { %3876 = vmatprep.subr.bf16.mxu1 %v5533_v34  ;;  %v3531_v59 = vpop.f32.mrb[12].mxu0 }
 0x245   :  { %v3572_v60 = vpop.f32.mrb[12].mxu1  ;;  %v3532_v61 = vadd.f32 %v3531_v59, %v5967_v49  ;;  %v3533_v62 = vpop.f32.mrb[13].mxu0  ;;  %v5540_v49 = vld [vmem:[#allocation4 + $0xe70] ss:$8 sps:$4 sm:$0xff]  }
 0x246   :  { %v3574_v63 = vpop.f32.mrb[13].mxu1  ;;  %v3534_v0 = vadd.f32 %v3533_v62, %v5969_v54  ;;  %v3535_v1 = vpop.f32.mrb[14].mxu0  ;;  %3836 = vmatpush1.bf16.msra.mxu0 %v5528_v55  ;;  %v5543_v54 = vld [vmem:[#allocation4 + $0xf70] ss:$8 sps:$4 sm:$0xff]  }
 0x247   :  { %v3576_v3 = vpop.f32.mrb[14].mxu1  ;;  %3877 = vmatpush1.bf16.msra.mxu1 %v5531_v56  ;;  %v5985_v7 = vadd.f32 %v3572_v60, %v3532_v61  ;;  %v3536_v8 = vpop.f32.mrb[15].mxu0  ;;  %3837 = vmatprep.subr.bf16.mxu0 %v5536_v57  ;;  %v3946_v61 = vld [vmem:[#allocation8 + $0x80] sm:$0xff]  ;;  %v3947_v62 = vld [vmem:[#allocation8 + $0x88] sm:$0xff] }
 0x248   :  { %v3577_v9 = vpop.f32.mrb[15].mxu1  ;;  %3878 = vmatprep.subr.bf16.mxu1 %v5539_v58  ;;  %v5987_v12 = vadd.f32 %v3574_v63, %v3534_v0  ;;  %v3930_v63 = vld [vmem:[#allocation8] sm:$0xff]  ;;  %v4757_v0 = vpack.c.bf16 %v3947_v62, %v3946_v61  ;;  %v3931_v1 = vld [vmem:[#allocation8 + $0x8] sm:$0xff]  ;;  %v3948_v3 = vld [vmem:[#allocation8 + $0x90] sm:$0xff]  ;;  %v5744_v61 = vmov 0  }
 0x249   :  { %v3933_v9 = vld [vmem:[#allocation8 + $0x18] sm:$0xff]  ;;  %4825 = vset.pattern.permute.xlu0 %v5744_v61 }
 0x24a   :  { %3838 = vmatpush1.bf16.msra.mxu0 %v5534_v4  ;;  %v3949_v4 = vld [vmem:[#allocation8 + $0x98] sm:$0xff] }
 0x24b   :  { %3879 = vmatpush1.bf16.msra.mxu1 %v5537_v5  ;;  %3839 = vmatprep.subr.bf16.mxu0 %v5542_v10  ;;  %v4759_v5 = vpack.c.bf16 %v3931_v1, %v3930_v63  ;;  %v4761_v8 = vpack.c.bf16 %v3949_v4, %v3948_v3  ;;  %v3950_v10 = vld [vmem:[#allocation8 + $0xa0] sm:$0xff]  ;;  %v4054_v63 = vld [vmem:[#allocation11 + $0x10] sm:$0xff]  ;;  %v4057_v4 = vld [vmem:[#allocation11 + $0x28] sm:$0xff] }
 0x24c   :  { %3880 = vmatprep.subr.bf16.mxu1 %v5545_v11  ;;  %v3951_v11 = vld [vmem:[#allocation8 + $0xa8] sm:$0xff] }
 0x24d   :  { %v4056_v3 = vld [vmem:[#allocation11 + $0x20] sm:$0xff] }
 0x24e   :  { %3840 = vmatpush1.bf16.msra.mxu0 %v5540_v49  ;;  %v4765_v49 = vpack.c.bf16 %v3951_v11, %v3950_v10  ;;  %v4060_v10 = vld [vmem:[#allocation11 + $0x40] sm:$0xff]  ;;  %v4061_v11 = vld [vmem:[#allocation11 + $0x48] sm:$0xff] }
 0x24f   :  { %3881 = vmatpush1.bf16.msra.mxu1 %v5543_v54  ;;  %3841 = vmatprep.subr.bf16.mxu0 %v5548_v13  ;;  %v3934_v54 = vld [vmem:[#allocation8 + $0x20] sm:$0xff]  ;;  %v3935_v13 = vld [vmem:[#allocation8 + $0x28] sm:$0xff] }
 0x250   :  { %3882 = vmatprep.subr.bf16.mxu1 %v5551_v14  ;;  %v3952_v14 = vld [vmem:[#allocation8 + $0xb0] sm:$0xff] }
 0x252   :  { %3842 = vmatpush1.bf16.msra.mxu0 %v5546_v15  ;;  %v3953_v15 = vld [vmem:[#allocation8 + $0xb8] sm:$0xff] }
 0x253   :  { %3883 = vmatpush1.bf16.msra.mxu1 %v5549_v16  ;;  %3843 = vmatprep.subr.bf16.mxu0 %v5554_v17  ;;  %v4767_v16 = vpack.c.bf16 %v3935_v13, %v3934_v54  ;;  %v4769_v17 = vpack.c.bf16 %v3953_v15, %v3952_v14  ;;  %v4063_v54 = vld [vmem:[#allocation11 + $0x58] sm:$0xff] }
 0x254   :  { %3884 = vmatprep.subr.bf16.mxu1 %v5557_v18  ;;  %v3936_v18 = vld [vmem:[#allocation8 + $0x30] sm:$0xff] }
 0x256   :  { %3844 = vmatpush1.bf16.msra.mxu0 %v5552_v19  ;;  %v3937_v19 = vld [vmem:[#allocation8 + $0x38] sm:$0xff] }
 0x257   :  { %3885 = vmatpush1.bf16.msra.mxu1 %v5555_v20  ;;  %3845 = vmatprep.subr.bf16.mxu0 %v5560_v21  ;;  %v3954_v20 = vld [vmem:[#allocation8 + $0xc0] sm:$0xff]  ;;  %v3955_v21 = vld [vmem:[#allocation8 + $0xc8] sm:$0xff] }
 0x258   :  { %3886 = vmatprep.subr.bf16.mxu1 %v5563_v22  ;;  %v4771_v22 = vpack.c.bf16 %v3937_v19, %v3936_v18 }
 0x25a   :  { %3846 = vmatpush1.bf16.msra.mxu0 %v5558_v23  ;;  %v4773_v23 = vpack.c.bf16 %v3955_v21, %v3954_v20 }
 0x25b   :  { %3887 = vmatpush1.bf16.msra.mxu1 %v5561_v24  ;;  %3847 = vmatprep.subr.bf16.mxu0 %v5566_v25  ;;  %v3938_v24 = vld [vmem:[#allocation8 + $0x40] sm:$0xff]  ;;  %v3939_v25 = vld [vmem:[#allocation8 + $0x48] sm:$0xff] }
 0x25c   :  { %3888 = vmatprep.subr.bf16.mxu1 %v5569_v26  ;;  %v3956_v26 = vld [vmem:[#allocation8 + $0xd0] sm:$0xff] }
 0x25e   :  { %3848 = vmatpush1.bf16.msra.mxu0 %v5564_v27  ;;  %v3957_v27 = vld [vmem:[#allocation8 + $0xd8] sm:$0xff] }
 0x25f   :  { %3889 = vmatpush1.bf16.msra.mxu1 %v5567_v28  ;;  %3849 = vmatprep.subr.bf16.mxu0 %v5572_v30  ;;  %v4775_v28 = vpack.c.bf16 %v3939_v25, %v3938_v24  ;;  %v4777_v30 = vpack.c.bf16 %v3957_v27, %v3956_v26  ;;  %v3918_v26 = vlaneseq }
 0x260   :  { %3890 = vmatprep.subr.bf16.mxu1 %v5575_v31  ;;  %v3940_v31 = vld [vmem:[#allocation8 + $0x50] sm:$0xff] }
 0x261   :  { %v3919_v27 = vshrl.u32 %v3918_v26, 7 }
 0x262   :  { %3850 = vmatpush1.bf16.msra.mxu0 %v5570_v32  ;;  %v3941_v32 = vld [vmem:[#allocation8 + $0x58] sm:$0xff] }
 0x263   :  { %3891 = vmatpush1.bf16.msra.mxu1 %v5573_v33  ;;  %3851 = vmatprep.subr.bf16.mxu0 %v5578_v2  ;;  %v4779_v33 = vpack.c.bf16 %v3941_v32, %v3940_v31  ;;  %v3958_v2 = vld [vmem:[#allocation8 + $0xe0] sm:$0xff]  ;;  %v3920_v31 = vsub.s32 0, %v3919_v27 }
 0x264   :  { %3892 = vmatprep.subr.bf16.mxu1 %v5581_v6  ;;  %v3959_v6 = vld [vmem:[#allocation8 + $0xe8] sm:$0xff] }
 0x266   :  { %3852 = vmatpush1.bf16.msra.mxu0 %v5576_v35  ;;  %v4781_v35 = vpack.c.bf16 %v3959_v6, %v3958_v2 }
 0x267   :  { %3893 = vmatpush1.bf16.msra.mxu1 %v5579_v36  ;;  %3853 = vmatprep.subr.bf16.mxu0 %v5584_v37  ;;  %v3942_v36 = vld [vmem:[#allocation8 + $0x60] sm:$0xff]  ;;  %v3943_v37 = vld [vmem:[#allocation8 + $0x68] sm:$0xff] }
 0x268   :  { %3894 = vmatprep.subr.bf16.mxu1 %v5587_v38 }
 0x26a   :  { %3854 = vmatpush1.bf16.msra.mxu0 %v5582_v39 }
 0x26b   :  { %3895 = vmatpush1.bf16.msra.mxu1 %v5585_v40  ;;  %3855 = vmatprep.subr.bf16.mxu0 %v5590_v41  ;;  %v4783_v40 = vpack.c.bf16 %v3943_v37, %v3942_v36 }
 0x26c   :  { %3896 = vmatprep.subr.bf16.mxu1 %v5593_v42 }
 0x26e   :  { %3856 = vmatpush1.bf16.msra.mxu0 %v5588_v43 }
 0x26f   :  { %3897 = vmatpush1.bf16.msra.mxu1 %v5591_v44  ;;  %4758 = vmatprep.subr.bf16.mxu0 %v4757_v0  ;;  %v4055_v0 = vld [vmem:[#allocation11 + $0x18] sm:$0xff] }
 0x270   :  { %v4793_v1 = vpack.c.bf16 %v4055_v0, %v4054_v63  ;;  %v4669_v63 = vld [vmem:[#allocation12] ss:$0 sm:$0xff] }
 0x271   :  { %3858 = vmatmul.mubr.bf16.vlgmr.msra.gmra.mrb[28].mxu0 %v175_v47  ;;  %v3960_v47 = vld [vmem:[#allocation8 + $0xf0] sm:$0xff] }
 0x272   :  { %3899 = vmatmul.mubr.bf16.vlgmr.msra.gmra.mrb[28].mxu1 %v177_v48  ;;  %4760 = vmatpush3.bf16.msra.mxu0 %v4759_v5  ;;  %v4796_v5 = vpack.c.bf16 %v4057_v4, %v4056_v3 }
 0x273   :  { %4762 = vmatprep.subr.bf16.mxu0 %v4761_v8  ;;  %v4058_v8 = vld [vmem:[#allocation11 + $0x30] sm:$0xff] }
 0x284   :  { %v3613_v50 = vpop.f32.mrb[16].mxu0 }
 0x285   :  { %v3654_v51 = vpop.f32.mrb[16].mxu1  ;;  %v3614_v52 = vadd.f32 %v3613_v50, %v5985_v7  ;;  %v3615_v53 = vpop.f32.mrb[17].mxu0  ;;  %v3932_v7 = vld [vmem:[#allocation8 + $0x10] sm:$0xff] }
 0x286   :  { %v3656_v29 = vpop.f32.mrb[17].mxu1  ;;  %v3616_v34 = vadd.f32 %v3615_v53, %v5987_v12  ;;  %v3617_v55 = vpop.f32.mrb[18].mxu0  ;;  %v4763_v12 = vpack.c.bf16 %v3933_v9, %v3932_v7  ;;  %v3944_v53 = vld [vmem:[#allocation8 + $0x70] sm:$0xff]  ;;  %v4059_v7 = vld [vmem:[#allocation11 + $0x38] sm:$0xff] }
 0x287   :  { %v3658_v56 = vpop.f32.mrb[18].mxu1  ;;  %v3655_v57 = vadd.f32 %v3654_v51, %v3614_v52  ;;  %v3618_v58 = vpop.f32.mrb[19].mxu0  ;;  %v3961_v52 = vld [vmem:[#allocation8 + $0xf8] sm:$0xff]  ;;  %v4799_v9 = vpack.c.bf16 %v4059_v7, %v4058_v8 }
 0x288   :  { %v3659_v59 = vpop.f32.mrb[19].mxu1  ;;  %v3657_v60 = vadd.f32 %v3656_v29, %v3616_v34  ;;  %4764 = vmatpush3.bf16.msra.mxu0 %v4763_v12  ;;  %v3945_v29 = vld [vmem:[#allocation8 + $0x78] sm:$0xff]  ;;  %v4785_v55 = vpack.c.bf16 %v3961_v52, %v3960_v47  ;;  %v4052_v58 = vld [vmem:[#allocation11] sm:$0xff]  ;;  %v4802_v12 = vpack.c.bf16 %v4061_v11, %v4060_v10 }
 0x289   :  { %4766 = vmatprep.subr.bf16.mxu0 %v4765_v49  ;;  %v4787_v56 = vpack.c.bf16 %v3945_v29, %v3944_v53  ;;  %v4053_v59 = vld [vmem:[#allocation11 + $0x8] sm:$0xff]  ;;  %v4062_v49 = vld [vmem:[#allocation11 + $0x50] sm:$0xff]  ;;  %v4064_v47 = vld [vmem:[#allocation11 + $0x60] sm:$0xff]  ;;  %v5747_v29 = vmov 0.0  }
 0x28a   :  { %v4790_v62 = vpack.c.bf16 %v4053_v59, %v4052_v58  ;;  %v4805_v13 = vpack.c.bf16 %v4063_v54, %v4062_v49  ;;  %v4067_v52 = vld [vmem:[#allocation11 + $0x78] sm:$0xff]  ;;  %4754 = vmatprep.mubr.msk.f32.mxu1 %vm5746_vm0, %v5747_v29 }
 0x28c   :  { %4768 = vmatpush3.bf16.msra.mxu0 %v4767_v16 }
 0x28d   :  { %4770 = vmatprep.subr.bf16.mxu0 %v4769_v17 }
 0x290   :  { %4772 = vmatpush3.bf16.msra.mxu0 %v4771_v22 }
 0x291   :  { %4774 = vmatprep.subr.bf16.mxu0 %v4773_v23 }
 0x294   :  { %4776 = vmatpush3.bf16.msra.mxu0 %v4775_v28  ;;  %v3924_v28 = vsub.s32 1, %v3919_v27 }
 0x295   :  { %4778 = vmatprep.subr.bf16.mxu0 %v4777_v30  ;;  %v3916_v30 = vld [vmem:[#allocation6] sm:$0x3] }
 0x296   :  { %v3925_v37 = vrot.slane %v3916_v30, %v3924_v28 }
 0x298   :  { %4780 = vmatpush3.bf16.msra.mxu0 %v4779_v33 }
 0x299   :  { %4782 = vmatprep.subr.bf16.mxu0 %v4781_v35 }
 0x29c   :  { %4784 = vmatpush3.bf16.msra.mxu0 %v4783_v40 }
 0x29d   :  { %4786 = vmatprep.subr.bf16.mxu0 %v4785_v55  ;;  %v4667_v55 = vld [vmem:[#allocation9] ss:$0 sm:$0xff] }
 0x2a0   :  { %4788 = vmatpush3.bf16.msra.mxu0 %v4787_v56 }
 0x2c4   :  { %v3695_v38 = vpop.f32.mrb[20].mxu0 }
 0x2c5   :  { %v3736_v39 = vpop.f32.mrb[20].mxu1  ;;  %v3696_v41 = vadd.f32 %v3695_v38, %v3655_v57  ;;  %v3697_v42 = vpop.f32.mrb[21].mxu0  ;;  %v4668_v57 = vld [vmem:[#allocation3] ss:$0 sm:$0xff] }
 0x2c6   :  { %v3738_v43 = vpop.f32.mrb[21].mxu1  ;;  %v3698_v44 = vadd.f32 %v3697_v42, %v3657_v60  ;;  %v3699_v45 = vpop.f32.mrb[22].mxu0  ;;  %v5745_v60 = vmov 0.0|0.0   ;;  %4047 = vperm.xlu0 %4825, %v4668_v57  }
 0x2c7   :  { %v3740_v46 = vpop.f32.mrb[22].mxu1  ;;  %v3737_v48 = vadd.f32 %v3736_v39, %v3696_v41  ;;  %v3700_v50 = vpop.f32.mrb[23].mxu0  ;;  %4789 = vmatprep.subr.bf16.mxu1 %v5745_v60  ;;  %v3921_v41 = vrot.slane %v3916_v30, %v3920_v31 }
 0x2c8   :  { %v3741_v51 = vpop.f32.mrb[23].mxu1  ;;  %v3739_v34 = vadd.f32 %v3738_v43, %v3698_v44  ;;  %4791 = vmatpush3.bf16.msra.mxu1 %v4790_v62 }
 0x2c9   :  { %4792 = vmatprep.subr.bf16.mxu1 %v5745_v60  ;;  %v4066_v51 = vld [vmem:[#allocation11 + $0x70] sm:$0xff] }
 0x2ca   :  { %v4811_v53 = vpack.c.bf16 %v4067_v52, %v4066_v51 }
 0x2cc   :  { %4794 = vmatpush3.bf16.msra.mxu1 %v4793_v1 }
 0x2cd   :  { %4795 = vmatprep.subr.bf16.mxu1 %v5745_v60 }
 0x2d0   :  { %4797 = vmatpush3.bf16.msra.mxu1 %v4796_v5 }
 0x2d1   :  { %4798 = vmatprep.subr.bf16.mxu1 %v5745_v60 }
 0x2d4   :  { %4800 = vmatpush3.bf16.msra.mxu1 %v4799_v9 }
 0x2d5   :  { %4801 = vmatprep.subr.bf16.mxu1 %v5745_v60 }
 0x2d8   :  { %4803 = vmatpush3.bf16.msra.mxu1 %v4802_v12 }
 0x2d9   :  { %4804 = vmatprep.subr.bf16.mxu1 %v5745_v60 }
 0x2dc   :  { %4806 = vmatpush3.bf16.msra.mxu1 %v4805_v13 }
 0x2dd   :  { %4807 = vmatprep.subr.bf16.mxu1 %v5745_v60 }
 0x304   :  { %v3777_v14 = vpop.f32.mrb[24].mxu0 }
 0x305   :  { %v3818_v15 = vpop.f32.mrb[24].mxu1  ;;  %v3778_v16 = vadd.f32 %v3777_v14, %v3737_v48  ;;  %v3779_v17 = vpop.f32.mrb[25].mxu0  ;;  %v4065_v48 = vld [vmem:[#allocation11 + $0x68] sm:$0xff] }
 0x306   :  { %v3820_v18 = vpop.f32.mrb[25].mxu1  ;;  %v3780_v19 = vadd.f32 %v3779_v17, %v3739_v34  ;;  %v3781_v20 = vpop.f32.mrb[26].mxu0  ;;  %v4808_v50 = vpack.c.bf16 %v4065_v48, %v4064_v47 }
 0x307   :  { %v3822_v21 = vpop.f32.mrb[26].mxu1  ;;  %v3819_v22 = vadd.f32 %v3818_v15, %v3778_v16  ;;  %v3782_v23 = vpop.f32.mrb[27].mxu0 }
 0x308   :  { %v3823_v24 = vpop.f32.mrb[27].mxu1  ;;  %v3821_v25 = vadd.f32 %v3820_v18, %v3780_v19  ;;  %4809 = vmatpush3.bf16.msra.mxu1 %v4808_v50 }
 0x309   :  { %4810 = vmatprep.subr.bf16.mxu1 %v5745_v60 }
 0x30c   :  { %4812 = vmatpush3.bf16.msra.mxu1 %v4811_v53 }
 0x344   :  { %v3859_v32 = vpop.f32.mrb[28].mxu0 }
 0x345   :  { %v3900_v33 = vpop.f32.mrb[28].mxu1  ;;  %v3860_v2 = vadd.f32 %v3859_v32, %v3819_v22  ;;  %v3861_v6 = vpop.f32.mrb[29].mxu0 }
 0x346   :  { %v3902_v35 = vpop.f32.mrb[29].mxu1  ;;  %v3862_v36 = vadd.f32 %v3861_v6, %v3821_v25  ;;  %v3863_v38 = vpop.f32.mrb[30].mxu0 }
 0x347   :  { %v3904_v39 = vpop.f32.mrb[30].mxu1  ;;  %v3901_v40 = vadd.f32 %v3900_v33, %v3860_v2  ;;  %v3864_v42 = vpop.f32.mrb[31].mxu0 }
 0x348   :  { %v3905_v43 = vpop.f32.mrb[31].mxu1  ;;  %v3903_v44 = vadd.f32 %v3902_v35, %v3862_v36  ;;  %v4048_v58 = vpop.permute.xlu0 %4047 }
 0x349   :  { %v3928_v46 = vadd.f32 %v3921_v41, %v3901_v40 }
 0x34a   :  { %v3929_v45 = vadd.f32 %v3925_v37, %v3903_v44 }
 0x34c   :  { %4033 = vmatprep.mubr.f32.mxu0 %v3929_v45 }
 0x34d   :  { %4034 = vmatmul.mubr.f32.vlgmr.msra.gmra.mrb[32].mxu0 %v3928_v46 }
 0x420   :  { %v4702_v34 = vpop.f32.mrb[32].mxu0 }
 0x421   :  { %v4703_v56 = vpop.f32.mrb[33].mxu0 }
 0x422   :  { %v4704_v57 = vadd.f32 %v4703_v56, %v4702_v34 }
 0x424   :  { %v4036_v59 = vadd.f32 %v4704_v57, %v4667_v55 }
 0x426   :  { %v4050_v61 = vmul.f32 %v4048_v58, %v4036_v59  ;;  %vm4039_vm1 = vcmp.ge.f32.partialorder %v4036_v59, 0.0 }
 0x428   :  { %v4051_v62 = vsel %vm4039_vm1, %v4036_v59, %v4050_v61 }
 0x429   :  { %4755 = vmatmul.mubr.f32.vlgmr.msra.gmra.mrb[32].mxu1 %v4051_v62 }
 0x4fc   :  { %v4141_v0 = vpop.f32.mrb[32].mxu1 }
 0x4fd   :  { %v4142_v60 = vadd.f32 %v4669_v63, %v4141_v0  ;;  %v4756_v1 = vpop.f32.mrb[33].mxu1 }
 0x4ff   :  { %5594 = vtanh.f32 %v4142_v60 }
 0x509   :  { %v5595_v3 = vpop.eup %5594 }
 0x50a   :  { %4146 = vst [vmem:[%s6016_s8] sm:$0xff] %v5595_v3 }
 0x50b   :  { %4151 = vsyncpa [#allocation5], 1 }
 0x50c   :  { %4152 = vsyncpa [#allocation7], 1 }
 0x50d   :  { %4153 = vsyncpa [#allocation10], 1 }
 0x50e   :  { %4154 = vsyncpa [#allocation13], 1 }

</bundles_post_ra>
